<compile_context>
chip_gen: v7x
topology: tpu7x:2x2x1
jax: 0.10.0
libtpu: 0.0.40
codegen_flags: <defaults>
</compile_context>

<pallas_src>
import functools
import math

import jax
import jax.numpy as jnp
from jax import lax
from jax.experimental import pallas as pl
from jax.experimental.pallas import tpu as pltpu


def mha_kernel(q_ref, k_ref, v_ref,
               wq_ref, bq_ref, wk_ref, bk_ref, wv_ref, bv_ref,
               wm_ref, bm_ref,
               out_ref, prob_ref,
               q_scr, k_scr, v_scr, ctx_scr,
               *, num_heads):
    block_b, seq, d_model = q_scr.shape
    heads = num_heads
    dim = d_model // heads
    tok = block_b * seq

    # Weights / biases: constant across the grid -> loaded once per step.
    wq = wq_ref[...]            # (D, D) bf16, output columns head-major, scale folded
    wk = wk_ref[...]
    wv = wv_ref[...]
    wm = wm_ref[...]            # (D, D) bf16, input rows head-major
    bq = bq_ref[...]            # (1, D) f32 -- broadcast over tokens once per slab
    bk = bk_ref[...]
    bv = bv_ref[...]
    bm = bm_ref[...]

    # --- batched input projections: ONE (tok, D) @ (D, D) MXU matmul each ---
    qp = jnp.dot(q_ref[...], wq, preferred_element_type=jnp.float32) + bq
    kp = jnp.dot(k_ref[...], wk, preferred_element_type=jnp.float32) + bk
    vp = jnp.dot(v_ref[...], wv, preferred_element_type=jnp.float32) + bv

    # Stash in VMEM scratch (bf16) so the per-item loop can index item b on the
    # leading axis.  seq % 8 == 0 makes this reshape a free sublane-split view.
    q_scr[...] = qp.reshape(block_b, seq, d_model).astype(q_scr.dtype)
    k_scr[...] = kp.reshape(block_b, seq, d_model).astype(k_scr.dtype)
    v_scr[...] = vp.reshape(block_b, seq, d_model).astype(v_scr.dtype)

    # --- per-item attention core; fori_loop bounds the (seq, seq) live ranges ---
    def body(b, carry):
        qb = q_scr[b]           # (seq, D) bf16, columns head-major (h*dim + d)
        kb = k_scr[b]
        vb = v_scr[b]
        ctx_heads = []
        for h in range(heads):                      # static unroll over heads
            lo = h * dim
            qh = qb[:, lo:lo + dim]                 # static lane slices
            kh = kb[:, lo:lo + dim]
            vh = vb[:, lo:lo + dim]
            s = jnp.einsum('nd,md->nm', qh, kh,
                           preferred_element_type=jnp.float32)   # (seq, seq) f32
            m = jnp.max(s, axis=-1, keepdims=True)
            e = jnp.exp(s - m)
            denom = jnp.sum(e, axis=-1, keepdims=True)
            # Exact reciprocal: prob is a returned output (rows should sum to ~1).
            p = e * pl.reciprocal(denom)
            # Write prob immediately: ends the f32 live range and lets the HBM
            # writeback DMA overlap the ctx / merge matmuls.
            prob_ref[b, h] = p.astype(prob_ref.dtype)
            ctx_heads.append(jnp.dot(p.astype(vb.dtype), vh,
                                     preferred_element_type=jnp.float32))
        ctx_scr[b] = jnp.concatenate(ctx_heads, axis=-1).astype(ctx_scr.dtype)
        return carry

    lax.fori_loop(0, block_b, body, 0)

    # --- merge projection: single (tok, D) @ (D, D) matmul on head-major ctx ---
    ctx = ctx_scr[...].reshape(tok, d_model)
    merged = jnp.dot(ctx, wm, preferred_element_type=jnp.float32) + bm
    out_ref[...] = merged.astype(out_ref.dtype)


def _vmem_budget_bytes():
    """Per-generation VMEM budget: ~85% of physical per-core VMEM.
    v7x (64 MiB) -> ~54 MiB; v5e/v6e (128 MiB) -> ~109 MiB."""
    phys = None
    try:
        info = pltpu.get_tpu_info()
        for attr in ("vmem_capacity_bytes", "vmem_bytes", "vmem_size_bytes"):
            if hasattr(info, attr):
                phys = int(getattr(info, attr))
                break
    except Exception:
        phys = None
    if not phys:
        phys = 64 * 1024 * 1024   # conservative fallback (v7x per-TensorCore VMEM)
    return int(phys * 0.85)


def _pick_block_b(B, D, N, H, budget):
    """Largest batch block that fits the VMEM budget (incl. prob writeback blocks)."""
    # Fixed per grid step (independent of block_b).
    fixed = 4 * D * D * 2 * 2            # 4 weights bf16, double-buffered
    fixed += 4 * D * 4 * 2               # 4 biases f32, double-buffered
    fixed += 3 * N * N * 4               # scores / exp / prob f32 (one item at a time)
    fixed += N * D * 4                   # per-item ctx assembly
    fixed += 2 * 1024 * 1024             # headroom for compiler-internal scratch
    # Per batch item inside the block.
    per_item = 3 * N * D * 2 * 2         # q/k/v bf16 input blocks, double-buffered
    per_item += N * D * 4 * 2            # merged f32 output block, double-buffered
    per_item += H * N * N * 2 * 2        # prob bf16 output block, double-buffered
    per_item += 4 * N * D * 2            # q/k/v/ctx VMEM scratch (bf16)
    per_item += 3 * N * D * 4            # projected q/k/v f32 values before the scratch store
    cap = max(1, (budget - fixed) // per_item)
    if B >= 2:
        cap = min(cap, B // 2)           # keep grid >= 2: v7x has 2 TensorCores/chip
    cap = min(cap, B)
    bb = 1
    for c in range(1, int(cap) + 1):     # largest divisor of B that fits
        if B % c == 0:
            bb = c
    return bb


def multi_headed_attention(q, k, v, params, num_heads, block_b=None):
    """q, k, v: (B, d_model, N) float32.
    Returns (merged (B, d_model, N) float32, prob (B, H, N, N) bfloat16)."""
    B, D, N = q.shape
    H = num_heads
    assert D % H == 0
    dim = D // H

    vmem_limit = _vmem_budget_bytes()
    if block_b is None:
        block_b = _pick_block_b(B, D, N, H, vmem_limit)
    assert B % block_b == 0

    Wq, bq, Wk, bk, Wv, bv, Wm, bm = params

    # Head-major output-channel permutation:
    #   new channel h*dim + d  <-  PyTorch channel d*H + h
    # (PyTorch's .view(B, dim, H, N) splits channel c into (d, h) with c = d*H + h.)
    perm = (jnp.arange(dim)[None, :] * H + jnp.arange(H)[:, None]).reshape(D)

    scale = 1.0 / math.sqrt(dim)
    # Projections are applied as tokens(B*N, D) @ W^T; output columns head-major;
    # 1/sqrt(dim) folded into the q projection.
    wq_p = (Wq[perm, :] * scale).T.astype(jnp.bfloat16)
    bq_p = (bq[perm] * scale).reshape(1, D).astype(jnp.float32)
    wk_p = Wk[perm, :].T.astype(jnp.bfloat16)
    bk_p = bk[perm].reshape(1, D).astype(jnp.float32)
    wv_p = Wv[perm, :].T.astype(jnp.bfloat16)
    bv_p = bv[perm].reshape(1, D).astype(jnp.float32)
    # The merge consumes head-major context columns -> permute its input channels.
    wm_p = Wm[:, perm].T.astype(jnp.bfloat16)
    bm_p = bm.reshape(1, D).astype(jnp.float32)

    # Token-major activations: (B, D, N) -> (B*N, D); channel dim on lanes so the
    # projection / merge loads and stores are lane-dense for realistic d_model.
    def to_tokens(x):
        return x.transpose(0, 2, 1).reshape(B * N, D).astype(jnp.bfloat16)

    qt, kt, vt = to_tokens(q), to_tokens(k), to_tokens(v)

    tok = block_b * N
    act_spec = pl.BlockSpec((tok, D), lambda i: (i, 0))
    w_spec = pl.BlockSpec((D, D), lambda i: (0, 0))
    b_spec = pl.BlockSpec((1, D), lambda i: (0, 0))

    out_shape = (
        jax.ShapeDtypeStruct((B * N, D), jnp.float32),
        jax.ShapeDtypeStruct((B, H, N, N), jnp.bfloat16),
    )
    out_specs = (
        pl.BlockSpec((tok, D), lambda i: (i, 0)),
        pl.BlockSpec((block_b, H, N, N), lambda i: (i, 0, 0, 0)),
    )

    scratch_shapes = [
        pltpu.VMEM((block_b, N, D), jnp.bfloat16),   # projected q (head-major cols)
        pltpu.VMEM((block_b, N, D), jnp.bfloat16),   # projected k
        pltpu.VMEM((block_b, N, D), jnp.bfloat16),   # projected v
        pltpu.VMEM((block_b, N, D), jnp.bfloat16),   # per-head context
    ]

    fn = pl.pallas_call(
        functools.partial(mha_kernel, num_heads=H),
        out_shape=out_shape,
        grid_spec=pltpu.PrefetchScalarGridSpec(
            num_scalar_prefetch=0,
            grid=(B // block_b,),
            in_specs=[act_spec, act_spec, act_spec,
                      w_spec, b_spec, w_spec, b_spec, w_spec, b_spec,
                      w_spec, b_spec],
            out_specs=out_specs,
            scratch_shapes=scratch_shapes,
        ),
        compiler_params=pltpu.CompilerParams(
            dimension_semantics=("parallel",),
            vmem_limit_bytes=int(vmem_limit),
        ),
    )
    out_tok, prob = fn(qt, kt, vt, wq_p, bq_p, wk_p, bk_p, wv_p, bv_p, wm_p, bm_p)
    out = out_tok.reshape(B, N, D).transpose(0, 2, 1)   # wrapper-side layout plumbing
    return out, prob


def reference_forward(q, k, v, params, num_heads):
    """Pure-JAX (f32) mirror of the PyTorch module forward (for verification)."""
    B, D, N = q.shape
    H = num_heads
    dim = D // H
    Wq, bq, Wk, bk, Wv, bv, Wm, bm = params

    def conv1(W, b, x):  # Conv1d kernel_size=1: (B, C, N) -> (B, C, N)
        return jnp.einsum('oc,bcn->bon', W, x) + b[None, :, None]

    qp = conv1(Wq, bq, q).reshape(B, dim, H, N)
    kp = conv1(Wk, bk, k).reshape(B, dim, H, N)
    vp = conv1(Wv, bv, v).reshape(B, dim, H, N)
    scores = jnp.einsum('bdhn,bdhm->bhnm', qp, kp) / (dim ** 0.5)
    prob = jax.nn.softmax(scores, axis=-1)
    x = jnp.einsum('bhnm,bdhm->bdhn', prob, vp)
    merged = conv1(Wm, bm, x.reshape(B, dim * H, N))
    return merged, prob


if __name__ == "__main__":
    # Small shapes consistent with the module: d_model=32, num_heads=4, seq=16, batch=2.
    B, D, N, H = 2, 32, 16, 4

    key = jax.random.PRNGKey(0)
    keys = jax.random.split(key, 12)
    bound = 1.0 / math.sqrt(D)  # PyTorch Conv1d default init range

    def wb(kw, kb):
        W = jax.random.uniform(kw, (D, D), jnp.float32, -bound, bound)
        b = jax.random.uniform(kb, (D,), jnp.float32, -bound, bound)
        return W, b

    Wq, bq = wb(keys[0], keys[1])
    Wk, bk = wb(keys[2], keys[3])
    Wv, bv = wb(keys[4], keys[5])
    Wm, bm = wb(keys[6], keys[7])
    params = (Wq, bq, Wk, bk, Wv, bv, Wm, bm)

    q = jax.random.normal(keys[8], (B, D, N), jnp.float32)
    k = jax.random.normal(keys[9], (B, D, N), jnp.float32)
    v = jax.random.normal(keys[10], (B, D, N), jnp.float32)

    out, prob = multi_headed_attention(q, k, v, params, num_heads=H)
    out = jax.block_until_ready(out)
    prob = jax.block_until_ready(prob)

    ref_out, ref_prob = reference_forward(q, k, v, params, num_heads=H)
    assert out.shape == (B, D, N) and prob.shape == (B, H, N, N)
    # Tolerances relaxed vs. pure-f32: MXU operands are bf16 and prob is stored bf16.
    assert jnp.allclose(out, ref_out, atol=5e-2, rtol=5e-2)
    assert jnp.allclose(prob.astype(jnp.float32), ref_prob, atol=2e-2, rtol=5e-2)

    print("KERNEL_OK")
</pallas_src>

<mosaic_0001>
module attributes {stable_mosaic.version = 11 : i64} {
  func.func @mha_kernel(%arg0: i32, %arg1: memref<16x32xbf16, #tpu.memory_space<vmem>>, %arg2: memref<16x32xbf16, #tpu.memory_space<vmem>>, %arg3: memref<16x32xbf16, #tpu.memory_space<vmem>>, %arg4: memref<32x32xbf16, #tpu.memory_space<vmem>>, %arg5: memref<1x32xf32, #tpu.memory_space<vmem>>, %arg6: memref<32x32xbf16, #tpu.memory_space<vmem>>, %arg7: memref<1x32xf32, #tpu.memory_space<vmem>>, %arg8: memref<32x32xbf16, #tpu.memory_space<vmem>>, %arg9: memref<1x32xf32, #tpu.memory_space<vmem>>, %arg10: memref<32x32xbf16, #tpu.memory_space<vmem>>, %arg11: memref<1x32xf32, #tpu.memory_space<vmem>>, %arg12: memref<16x32xf32, #tpu.memory_space<vmem>>, %arg13: memref<1x4x16x16xbf16, #tpu.memory_space<vmem>>, %arg14: memref<1x16x32xbf16, #tpu.memory_space<vmem>>, %arg15: memref<1x16x32xbf16, #tpu.memory_space<vmem>>, %arg16: memref<1x16x32xbf16, #tpu.memory_space<vmem>>, %arg17: memref<1x16x32xbf16, #tpu.memory_space<vmem>>) attributes {dimension_semantics = [#tpu.dimension_semantics<parallel>], iteration_bounds = array<i64: 2>, scalar_prefetch = 0 : i64, scratch_operands = 4 : i64, tpu.core_type = #tpu.core_type<tc>, window_params = [{transform_indices = @transform_0, window_bounds = array<i64: 16, 32>}, {transform_indices = @transform_1, window_bounds = array<i64: 16, 32>}, {transform_indices = @transform_2, window_bounds = array<i64: 16, 32>}, {pipeline_mode = #tpu.pipeline_mode<synchronous>, transform_indices = @transform_3, window_bounds = array<i64: 32, 32>}, {pipeline_mode = #tpu.pipeline_mode<synchronous>, transform_indices = @transform_4, window_bounds = array<i64: 1, 32>}, {pipeline_mode = #tpu.pipeline_mode<synchronous>, transform_indices = @transform_5, window_bounds = array<i64: 32, 32>}, {pipeline_mode = #tpu.pipeline_mode<synchronous>, transform_indices = @transform_6, window_bounds = array<i64: 1, 32>}, {pipeline_mode = #tpu.pipeline_mode<synchronous>, transform_indices = @transform_7, window_bounds = array<i64: 32, 32>}, {pipeline_mode = #tpu.pipeline_mode<synchronous>, transform_indices = @transform_8, window_bounds = array<i64: 1, 32>}, {pipeline_mode = #tpu.pipeline_mode<synchronous>, transform_indices = @transform_9, window_bounds = array<i64: 32, 32>}, {pipeline_mode = #tpu.pipeline_mode<synchronous>, transform_indices = @transform_10, window_bounds = array<i64: 1, 32>}, {transform_indices = @transform_11, window_bounds = array<i64: 16, 32>}, {transform_indices = @transform_12, window_bounds = array<i64: 1, 4, 16, 16>}]} {
    %c0 = arith.constant 0 : index
    %c0_0 = arith.constant 0 : index
    %0 = vector.load %arg4[%c0, %c0_0] : memref<32x32xbf16, #tpu.memory_space<vmem>>, vector<32x32xbf16>
    %c0_1 = arith.constant 0 : index
    %c0_2 = arith.constant 0 : index
    %1 = vector.load %arg6[%c0_1, %c0_2] : memref<32x32xbf16, #tpu.memory_space<vmem>>, vector<32x32xbf16>
    %c0_3 = arith.constant 0 : index
    %c0_4 = arith.constant 0 : index
    %2 = vector.load %arg8[%c0_3, %c0_4] : memref<32x32xbf16, #tpu.memory_space<vmem>>, vector<32x32xbf16>
    %c0_5 = arith.constant 0 : index
    %c0_6 = arith.constant 0 : index
    %3 = vector.load %arg10[%c0_5, %c0_6] : memref<32x32xbf16, #tpu.memory_space<vmem>>, vector<32x32xbf16>
    %c0_7 = arith.constant 0 : index
    %c0_8 = arith.constant 0 : index
    %4 = vector.load %arg5[%c0_7, %c0_8] : memref<1x32xf32, #tpu.memory_space<vmem>>, vector<1x32xf32>
    %c0_9 = arith.constant 0 : index
    %c0_10 = arith.constant 0 : index
    %5 = vector.load %arg7[%c0_9, %c0_10] : memref<1x32xf32, #tpu.memory_space<vmem>>, vector<1x32xf32>
    %c0_11 = arith.constant 0 : index
    %c0_12 = arith.constant 0 : index
    %6 = vector.load %arg9[%c0_11, %c0_12] : memref<1x32xf32, #tpu.memory_space<vmem>>, vector<1x32xf32>
    %c0_13 = arith.constant 0 : index
    %c0_14 = arith.constant 0 : index
    %7 = vector.load %arg11[%c0_13, %c0_14] : memref<1x32xf32, #tpu.memory_space<vmem>>, vector<1x32xf32>
    %c0_15 = arith.constant 0 : index
    %c0_16 = arith.constant 0 : index
    %8 = vector.load %arg1[%c0_15, %c0_16] : memref<16x32xbf16, #tpu.memory_space<vmem>>, vector<16x32xbf16>
    %cst = arith.constant dense<0.000000e+00> : vector<16x32xf32>
    %9 = tpu.matmul %8, %0, %cst {dimension_numbers = #tpu.dot_dimension_numbers<[1], [0], [0], [1], [0, 0, 1, 1], [], []>} : vector<16x32xbf16>, vector<32x32xbf16>, vector<16x32xf32> -> vector<16x32xf32>
    %10 = vector.broadcast %4 : vector<1x32xf32> to vector<16x32xf32>
    %11 = arith.addf %9, %10 : vector<16x32xf32>
    %c0_17 = arith.constant 0 : index
    %c0_18 = arith.constant 0 : index
    %12 = vector.load %arg2[%c0_17, %c0_18] : memref<16x32xbf16, #tpu.memory_space<vmem>>, vector<16x32xbf16>
    %cst_19 = arith.constant dense<0.000000e+00> : vector<16x32xf32>
    %13 = tpu.matmul %12, %1, %cst_19 {dimension_numbers = #tpu.dot_dimension_numbers<[1], [0], [0], [1], [0, 0, 1, 1], [], []>} : vector<16x32xbf16>, vector<32x32xbf16>, vector<16x32xf32> -> vector<16x32xf32>
    %14 = vector.broadcast %5 : vector<1x32xf32> to vector<16x32xf32>
    %15 = arith.addf %13, %14 : vector<16x32xf32>
    %c0_20 = arith.constant 0 : index
    %c0_21 = arith.constant 0 : index
    %16 = vector.load %arg3[%c0_20, %c0_21] : memref<16x32xbf16, #tpu.memory_space<vmem>>, vector<16x32xbf16>
    %cst_22 = arith.constant dense<0.000000e+00> : vector<16x32xf32>
    %17 = tpu.matmul %16, %2, %cst_22 {dimension_numbers = #tpu.dot_dimension_numbers<[1], [0], [0], [1], [0, 0, 1, 1], [], []>} : vector<16x32xbf16>, vector<32x32xbf16>, vector<16x32xf32> -> vector<16x32xf32>
    %18 = vector.broadcast %6 : vector<1x32xf32> to vector<16x32xf32>
    %19 = arith.addf %17, %18 : vector<16x32xf32>
    %20 = vector.shape_cast %11 : vector<16x32xf32> to vector<1x16x32xf32>
    %21 = arith.truncf %20 : vector<1x16x32xf32> to vector<1x16x32xbf16>
    %c0_23 = arith.constant 0 : index
    %c0_24 = arith.constant 0 : index
    %c0_25 = arith.constant 0 : index
    %22 = vector.load %arg14[%c0_23, %c0_24, %c0_25] : memref<1x16x32xbf16, #tpu.memory_space<vmem>>, vector<1x16x32xbf16>
    tpu.vector_store %arg14[%c0_23, %c0_24, %c0_25], %21 {strides = array<i32>} : memref<1x16x32xbf16, #tpu.memory_space<vmem>>, vector<1x16x32xbf16>,
    %23 = vector.shape_cast %15 : vector<16x32xf32> to vector<1x16x32xf32>
    %24 = arith.truncf %23 : vector<1x16x32xf32> to vector<1x16x32xbf16>
    %c0_26 = arith.constant 0 : index
    %c0_27 = arith.constant 0 : index
    %c0_28 = arith.constant 0 : index
    %25 = vector.load %arg15[%c0_26, %c0_27, %c0_28] : memref<1x16x32xbf16, #tpu.memory_space<vmem>>, vector<1x16x32xbf16>
    tpu.vector_store %arg15[%c0_26, %c0_27, %c0_28], %24 {strides = array<i32>} : memref<1x16x32xbf16, #tpu.memory_space<vmem>>, vector<1x16x32xbf16>,
    %26 = vector.shape_cast %19 : vector<16x32xf32> to vector<1x16x32xf32>
    %27 = arith.truncf %26 : vector<1x16x32xf32> to vector<1x16x32xbf16>
    %c0_29 = arith.constant 0 : index
    %c0_30 = arith.constant 0 : index
    %c0_31 = arith.constant 0 : index
    %28 = vector.load %arg16[%c0_29, %c0_30, %c0_31] : memref<1x16x32xbf16, #tpu.memory_space<vmem>>, vector<1x16x32xbf16>
    tpu.vector_store %arg16[%c0_29, %c0_30, %c0_31], %27 {strides = array<i32>} : memref<1x16x32xbf16, #tpu.memory_space<vmem>>, vector<1x16x32xbf16>,
    %c0_i32 = arith.constant 0 : i32
    %29 = arith.index_cast %c0_i32 : i32 to index
    %c0_32 = arith.constant 0 : index
    %c0_33 = arith.constant 0 : index
    %30 = vector.load %arg14[%29, %c0_32, %c0_33] : memref<1x16x32xbf16, #tpu.memory_space<vmem>>, vector<1x16x32xbf16>
    %31 = vector.shape_cast %30 : vector<1x16x32xbf16> to vector<16x32xbf16>
    %32 = arith.index_cast %c0_i32 : i32 to index
    %c0_34 = arith.constant 0 : index
    %c0_35 = arith.constant 0 : index
    %33 = vector.load %arg15[%32, %c0_34, %c0_35] : memref<1x16x32xbf16, #tpu.memory_space<vmem>>, vector<1x16x32xbf16>
    %34 = vector.shape_cast %33 : vector<1x16x32xbf16> to vector<16x32xbf16>
    %35 = arith.index_cast %c0_i32 : i32 to index
    %c0_36 = arith.constant 0 : index
    %c0_37 = arith.constant 0 : index
    %36 = vector.load %arg16[%35, %c0_36, %c0_37] : memref<1x16x32xbf16, #tpu.memory_space<vmem>>, vector<1x16x32xbf16>
    %37 = vector.shape_cast %36 : vector<1x16x32xbf16> to vector<16x32xbf16>
    %38 = vector.extract_strided_slice %31 {offsets = [0, 0], sizes = [16, 8], strides = [1, 1]} : vector<16x32xbf16> to vector<16x8xbf16>
    %39 = vector.extract_strided_slice %34 {offsets = [0, 0], sizes = [16, 8], strides = [1, 1]} : vector<16x32xbf16> to vector<16x8xbf16>
    %40 = vector.extract_strided_slice %37 {offsets = [0, 0], sizes = [16, 8], strides = [1, 1]} : vector<16x32xbf16> to vector<16x8xbf16>
    "tpu.trace_start"() <{level = 10 : i32, message = "nd,md->nm"}> : () -> ()
    %cst_38 = arith.constant dense<0.000000e+00> : vector<16x16xf32>
    %41 = tpu.matmul %38, %39, %cst_38 {dimension_numbers = #tpu.dot_dimension_numbers<[1], [1], [0], [0], [0, 0, 1, 0], [], []>} : vector<16x8xbf16>, vector<16x8xbf16>, vector<16x16xf32> -> vector<16x16xf32>
    "tpu.trace_stop"() : () -> ()
    %cst_39 = arith.constant dense<0xFF800000> : vector<16xf32>
    %42 = vector.multi_reduction <maximumf>, %41, %cst_39 [1] : vector<16x16xf32> to vector<16xf32>
    %43 = vector.shape_cast %42 : vector<16xf32> to vector<16x1xf32>
    %44 = vector.broadcast %43 : vector<16x1xf32> to vector<16x16xf32>
    %45 = arith.subf %41, %44 : vector<16x16xf32>
    %46 = math.exp %45 : vector<16x16xf32>
    %cst_40 = arith.constant dense<0.000000e+00> : vector<16xf32>
    %47 = vector.multi_reduction <add>, %46, %cst_40 [1] : vector<16x16xf32> to vector<16xf32>
    %48 = vector.shape_cast %47 : vector<16xf32> to vector<16x1xf32>
    %49 = tpu.reciprocal %48 : vector<16x1xf32> -> vector<16x1xf32>
    %50 = vector.broadcast %49 : vector<16x1xf32> to vector<16x16xf32>
    %51 = arith.mulf %46, %50 : vector<16x16xf32>
    %52 = arith.truncf %51 : vector<16x16xf32> to vector<16x16xbf16>
    %53 = arith.index_cast %c0_i32 : i32 to index
    %c0_41 = arith.constant 0 : index
    %c0_42 = arith.constant 0 : index
    %c0_43 = arith.constant 0 : index
    %54 = vector.load %arg13[%53, %c0_41, %c0_42, %c0_43] : memref<1x4x16x16xbf16, #tpu.memory_space<vmem>>, vector<1x1x16x16xbf16>
    %55 = vector.shape_cast %54 : vector<1x1x16x16xbf16> to vector<16x16xbf16>
    %56 = vector.shape_cast %52 : vector<16x16xbf16> to vector<1x1x16x16xbf16>
    tpu.vector_store %arg13[%53, %c0_41, %c0_42, %c0_43], %56 {strides = array<i32>} : memref<1x4x16x16xbf16, #tpu.memory_space<vmem>>, vector<1x1x16x16xbf16>,
    %57 = arith.truncf %51 : vector<16x16xf32> to vector<16x16xbf16>
    %cst_44 = arith.constant dense<0.000000e+00> : vector<16x8xf32>
    %58 = tpu.matmul %57, %40, %cst_44 {dimension_numbers = #tpu.dot_dimension_numbers<[1], [0], [0], [1], [0, 0, 1, 1], [], []>} : vector<16x16xbf16>, vector<16x8xbf16>, vector<16x8xf32> -> vector<16x8xf32>
    %59 = vector.extract_strided_slice %31 {offsets = [0, 8], sizes = [16, 8], strides = [1, 1]} : vector<16x32xbf16> to vector<16x8xbf16>
    %60 = vector.extract_strided_slice %34 {offsets = [0, 8], sizes = [16, 8], strides = [1, 1]} : vector<16x32xbf16> to vector<16x8xbf16>
    %61 = vector.extract_strided_slice %37 {offsets = [0, 8], sizes = [16, 8], strides = [1, 1]} : vector<16x32xbf16> to vector<16x8xbf16>
    "tpu.trace_start"() <{level = 10 : i32, message = "nd,md->nm"}> : () -> ()
    %cst_45 = arith.constant dense<0.000000e+00> : vector<16x16xf32>
    %62 = tpu.matmul %59, %60, %cst_45 {dimension_numbers = #tpu.dot_dimension_numbers<[1], [1], [0], [0], [0, 0, 1, 0], [], []>} : vector<16x8xbf16>, vector<16x8xbf16>, vector<16x16xf32> -> vector<16x16xf32>
    "tpu.trace_stop"() : () -> ()
    %cst_46 = arith.constant dense<0xFF800000> : vector<16xf32>
    %63 = vector.multi_reduction <maximumf>, %62, %cst_46 [1] : vector<16x16xf32> to vector<16xf32>
    %64 = vector.shape_cast %63 : vector<16xf32> to vector<16x1xf32>
    %65 = vector.broadcast %64 : vector<16x1xf32> to vector<16x16xf32>
    %66 = arith.subf %62, %65 : vector<16x16xf32>
    %67 = math.exp %66 : vector<16x16xf32>
    %cst_47 = arith.constant dense<0.000000e+00> : vector<16xf32>
    %68 = vector.multi_reduction <add>, %67, %cst_47 [1] : vector<16x16xf32> to vector<16xf32>
    %69 = vector.shape_cast %68 : vector<16xf32> to vector<16x1xf32>
    %70 = tpu.reciprocal %69 : vector<16x1xf32> -> vector<16x1xf32>
    %71 = vector.broadcast %70 : vector<16x1xf32> to vector<16x16xf32>
    %72 = arith.mulf %67, %71 : vector<16x16xf32>
    %73 = arith.truncf %72 : vector<16x16xf32> to vector<16x16xbf16>
    %74 = arith.index_cast %c0_i32 : i32 to index
    %c1 = arith.constant 1 : index
    %c0_48 = arith.constant 0 : index
    %c0_49 = arith.constant 0 : index
    %75 = vector.load %arg13[%74, %c1, %c0_48, %c0_49] : memref<1x4x16x16xbf16, #tpu.memory_space<vmem>>, vector<1x1x16x16xbf16>
    %76 = vector.shape_cast %75 : vector<1x1x16x16xbf16> to vector<16x16xbf16>
    %77 = vector.shape_cast %73 : vector<16x16xbf16> to vector<1x1x16x16xbf16>
    tpu.vector_store %arg13[%74, %c1, %c0_48, %c0_49], %77 {strides = array<i32>} : memref<1x4x16x16xbf16, #tpu.memory_space<vmem>>, vector<1x1x16x16xbf16>,
    %78 = arith.truncf %72 : vector<16x16xf32> to vector<16x16xbf16>
    %cst_50 = arith.constant dense<0.000000e+00> : vector<16x8xf32>
    %79 = tpu.matmul %78, %61, %cst_50 {dimension_numbers = #tpu.dot_dimension_numbers<[1], [0], [0], [1], [0, 0, 1, 1], [], []>} : vector<16x16xbf16>, vector<16x8xbf16>, vector<16x8xf32> -> vector<16x8xf32>
    %80 = vector.extract_strided_slice %31 {offsets = [0, 16], sizes = [16, 8], strides = [1, 1]} : vector<16x32xbf16> to vector<16x8xbf16>
    %81 = vector.extract_strided_slice %34 {offsets = [0, 16], sizes = [16, 8], strides = [1, 1]} : vector<16x32xbf16> to vector<16x8xbf16>
    %82 = vector.extract_strided_slice %37 {offsets = [0, 16], sizes = [16, 8], strides = [1, 1]} : vector<16x32xbf16> to vector<16x8xbf16>
    "tpu.trace_start"() <{level = 10 : i32, message = "nd,md->nm"}> : () -> ()
    %cst_51 = arith.constant dense<0.000000e+00> : vector<16x16xf32>
    %83 = tpu.matmul %80, %81, %cst_51 {dimension_numbers = #tpu.dot_dimension_numbers<[1], [1], [0], [0], [0, 0, 1, 0], [], []>} : vector<16x8xbf16>, vector<16x8xbf16>, vector<16x16xf32> -> vector<16x16xf32>
    "tpu.trace_stop"() : () -> ()
    %cst_52 = arith.constant dense<0xFF800000> : vector<16xf32>
    %84 = vector.multi_reduction <maximumf>, %83, %cst_52 [1] : vector<16x16xf32> to vector<16xf32>
    %85 = vector.shape_cast %84 : vector<16xf32> to vector<16x1xf32>
    %86 = vector.broadcast %85 : vector<16x1xf32> to vector<16x16xf32>
    %87 = arith.subf %83, %86 : vector<16x16xf32>
    %88 = math.exp %87 : vector<16x16xf32>
    %cst_53 = arith.constant dense<0.000000e+00> : vector<16xf32>
    %89 = vector.multi_reduction <add>, %88, %cst_53 [1] : vector<16x16xf32> to vector<16xf32>
    %90 = vector.shape_cast %89 : vector<16xf32> to vector<16x1xf32>
    %91 = tpu.reciprocal %90 : vector<16x1xf32> -> vector<16x1xf32>
    %92 = vector.broadcast %91 : vector<16x1xf32> to vector<16x16xf32>
    %93 = arith.mulf %88, %92 : vector<16x16xf32>
    %94 = arith.truncf %93 : vector<16x16xf32> to vector<16x16xbf16>
    %95 = arith.index_cast %c0_i32 : i32 to index
    %c2 = arith.constant 2 : index
    %c0_54 = arith.constant 0 : index
    %c0_55 = arith.constant 0 : index
    %96 = vector.load %arg13[%95, %c2, %c0_54, %c0_55] : memref<1x4x16x16xbf16, #tpu.memory_space<vmem>>, vector<1x1x16x16xbf16>
    %97 = vector.shape_cast %96 : vector<1x1x16x16xbf16> to vector<16x16xbf16>
    %98 = vector.shape_cast %94 : vector<16x16xbf16> to vector<1x1x16x16xbf16>
    tpu.vector_store %arg13[%95, %c2, %c0_54, %c0_55], %98 {strides = array<i32>} : memref<1x4x16x16xbf16, #tpu.memory_space<vmem>>, vector<1x1x16x16xbf16>,
    %99 = arith.truncf %93 : vector<16x16xf32> to vector<16x16xbf16>
    %cst_56 = arith.constant dense<0.000000e+00> : vector<16x8xf32>
    %100 = tpu.matmul %99, %82, %cst_56 {dimension_numbers = #tpu.dot_dimension_numbers<[1], [0], [0], [1], [0, 0, 1, 1], [], []>} : vector<16x16xbf16>, vector<16x8xbf16>, vector<16x8xf32> -> vector<16x8xf32>
    %101 = vector.extract_strided_slice %31 {offsets = [0, 24], sizes = [16, 8], strides = [1, 1]} : vector<16x32xbf16> to vector<16x8xbf16>
    %102 = vector.extract_strided_slice %34 {offsets = [0, 24], sizes = [16, 8], strides = [1, 1]} : vector<16x32xbf16> to vector<16x8xbf16>
    %103 = vector.extract_strided_slice %37 {offsets = [0, 24], sizes = [16, 8], strides = [1, 1]} : vector<16x32xbf16> to vector<16x8xbf16>
    "tpu.trace_start"() <{level = 10 : i32, message = "nd,md->nm"}> : () -> ()
    %cst_57 = arith.constant dense<0.000000e+00> : vector<16x16xf32>
    %104 = tpu.matmul %101, %102, %cst_57 {dimension_numbers = #tpu.dot_dimension_numbers<[1], [1], [0], [0], [0, 0, 1, 0], [], []>} : vector<16x8xbf16>, vector<16x8xbf16>, vector<16x16xf32> -> vector<16x16xf32>
    "tpu.trace_stop"() : () -> ()
    %cst_58 = arith.constant dense<0xFF800000> : vector<16xf32>
    %105 = vector.multi_reduction <maximumf>, %104, %cst_58 [1] : vector<16x16xf32> to vector<16xf32>
    %106 = vector.shape_cast %105 : vector<16xf32> to vector<16x1xf32>
    %107 = vector.broadcast %106 : vector<16x1xf32> to vector<16x16xf32>
    %108 = arith.subf %104, %107 : vector<16x16xf32>
    %109 = math.exp %108 : vector<16x16xf32>
    %cst_59 = arith.constant dense<0.000000e+00> : vector<16xf32>
    %110 = vector.multi_reduction <add>, %109, %cst_59 [1] : vector<16x16xf32> to vector<16xf32>
    %111 = vector.shape_cast %110 : vector<16xf32> to vector<16x1xf32>
    %112 = tpu.reciprocal %111 : vector<16x1xf32> -> vector<16x1xf32>
    %113 = vector.broadcast %112 : vector<16x1xf32> to vector<16x16xf32>
    %114 = arith.mulf %109, %113 : vector<16x16xf32>
    %115 = arith.truncf %114 : vector<16x16xf32> to vector<16x16xbf16>
    %116 = arith.index_cast %c0_i32 : i32 to index
    %c3 = arith.constant 3 : index
    %c0_60 = arith.constant 0 : index
    %c0_61 = arith.constant 0 : index
    %117 = vector.load %arg13[%116, %c3, %c0_60, %c0_61] : memref<1x4x16x16xbf16, #tpu.memory_space<vmem>>, vector<1x1x16x16xbf16>
    %118 = vector.shape_cast %117 : vector<1x1x16x16xbf16> to vector<16x16xbf16>
    %119 = vector.shape_cast %115 : vector<16x16xbf16> to vector<1x1x16x16xbf16>
    tpu.vector_store %arg13[%116, %c3, %c0_60, %c0_61], %119 {strides = array<i32>} : memref<1x4x16x16xbf16, #tpu.memory_space<vmem>>, vector<1x1x16x16xbf16>,
    %120 = arith.truncf %114 : vector<16x16xf32> to vector<16x16xbf16>
    %cst_62 = arith.constant dense<0.000000e+00> : vector<16x8xf32>
    %121 = tpu.matmul %120, %103, %cst_62 {dimension_numbers = #tpu.dot_dimension_numbers<[1], [0], [0], [1], [0, 0, 1, 1], [], []>} : vector<16x16xbf16>, vector<16x8xbf16>, vector<16x8xf32> -> vector<16x8xf32>
    %122 = tpu.concatenate %58, %79, %100, %121 in 1 : vector<16x8xf32>, vector<16x8xf32>, vector<16x8xf32>, vector<16x8xf32> -> vector<16x32xf32>
    %123 = arith.truncf %122 : vector<16x32xf32> to vector<16x32xbf16>
    %124 = arith.index_cast %c0_i32 : i32 to index
    %c0_63 = arith.constant 0 : index
    %c0_64 = arith.constant 0 : index
    %125 = vector.load %arg17[%124, %c0_63, %c0_64] : memref<1x16x32xbf16, #tpu.memory_space<vmem>>, vector<1x16x32xbf16>
    %126 = vector.shape_cast %125 : vector<1x16x32xbf16> to vector<16x32xbf16>
    %127 = vector.shape_cast %123 : vector<16x32xbf16> to vector<1x16x32xbf16>
    tpu.vector_store %arg17[%124, %c0_63, %c0_64], %127 {strides = array<i32>} : memref<1x16x32xbf16, #tpu.memory_space<vmem>>, vector<1x16x32xbf16>,
    %c1_i32 = arith.constant 1 : i32
    %c0_65 = arith.constant 0 : index
    %c0_66 = arith.constant 0 : index
    %c0_67 = arith.constant 0 : index
    %128 = vector.load %arg17[%c0_65, %c0_66, %c0_67] : memref<1x16x32xbf16, #tpu.memory_space<vmem>>, vector<1x16x32xbf16>
    %129 = vector.shape_cast %128 : vector<1x16x32xbf16> to vector<16x32xbf16>
    %cst_68 = arith.constant dense<0.000000e+00> : vector<16x32xf32>
    %130 = tpu.matmul %129, %3, %cst_68 {dimension_numbers = #tpu.dot_dimension_numbers<[1], [0], [0], [1], [0, 0, 1, 1], [], []>} : vector<16x32xbf16>, vector<32x32xbf16>, vector<16x32xf32> -> vector<16x32xf32>
    %131 = vector.broadcast %7 : vector<1x32xf32> to vector<16x32xf32>
    %132 = arith.addf %130, %131 : vector<16x32xf32>
    %c0_69 = arith.constant 0 : index
    %c0_70 = arith.constant 0 : index
    %133 = vector.load %arg12[%c0_69, %c0_70] : memref<16x32xf32, #tpu.memory_space<vmem>>, vector<16x32xf32>
    tpu.vector_store %arg12[%c0_69, %c0_70], %132 {strides = array<i32>} : memref<16x32xf32, #tpu.memory_space<vmem>>, vector<16x32xf32>,
    return
  }
  func.func @transform_0(%arg0: i32) -> (i32, i32) {
    %c0_i32 = arith.constant 0 : i32
    %c0_i32_0 = arith.constant 0 : i32
    return %arg0, %c0_i32 : i32, i32
  }
  func.func @transform_1(%arg0: i32) -> (i32, i32) {
    %c0_i32 = arith.constant 0 : i32
    %c0_i32_0 = arith.constant 0 : i32
    return %arg0, %c0_i32 : i32, i32
  }
  func.func @transform_2(%arg0: i32) -> (i32, i32) {
    %c0_i32 = arith.constant 0 : i32
    %c0_i32_0 = arith.constant 0 : i32
    return %arg0, %c0_i32 : i32, i32
  }
  func.func @transform_3(%arg0: i32) -> (i32, i32) {
    %c0_i32 = arith.constant 0 : i32
    %c0_i32_0 = arith.constant 0 : i32
    %c0_i32_1 = arith.constant 0 : i32
    return %c0_i32, %c0_i32_0 : i32, i32
  }
  func.func @transform_4(%arg0: i32) -> (i32, i32) {
    %c0_i32 = arith.constant 0 : i32
    %c0_i32_0 = arith.constant 0 : i32
    %c0_i32_1 = arith.constant 0 : i32
    return %c0_i32, %c0_i32_0 : i32, i32
  }
  func.func @transform_5(%arg0: i32) -> (i32, i32) {
    %c0_i32 = arith.constant 0 : i32
    %c0_i32_0 = arith.constant 0 : i32
    %c0_i32_1 = arith.constant 0 : i32
    return %c0_i32, %c0_i32_0 : i32, i32
  }
  func.func @transform_6(%arg0: i32) -> (i32, i32) {
    %c0_i32 = arith.constant 0 : i32
    %c0_i32_0 = arith.constant 0 : i32
    %c0_i32_1 = arith.constant 0 : i32
    return %c0_i32, %c0_i32_0 : i32, i32
  }
  func.func @transform_7(%arg0: i32) -> (i32, i32) {
    %c0_i32 = arith.constant 0 : i32
    %c0_i32_0 = arith.constant 0 : i32
    %c0_i32_1 = arith.constant 0 : i32
    return %c0_i32, %c0_i32_0 : i32, i32
  }
  func.func @transform_8(%arg0: i32) -> (i32, i32) {
    %c0_i32 = arith.constant 0 : i32
    %c0_i32_0 = arith.constant 0 : i32
    %c0_i32_1 = arith.constant 0 : i32
    return %c0_i32, %c0_i32_0 : i32, i32
  }
  func.func @transform_9(%arg0: i32) -> (i32, i32) {
    %c0_i32 = arith.constant 0 : i32
    %c0_i32_0 = arith.constant 0 : i32
    %c0_i32_1 = arith.constant 0 : i32
    return %c0_i32, %c0_i32_0 : i32, i32
  }
  func.func @transform_10(%arg0: i32) -> (i32, i32) {
    %c0_i32 = arith.constant 0 : i32
    %c0_i32_0 = arith.constant 0 : i32
    %c0_i32_1 = arith.constant 0 : i32
    return %c0_i32, %c0_i32_0 : i32, i32
  }
  func.func @transform_11(%arg0: i32) -> (i32, i32) {
    %c0_i32 = arith.constant 0 : i32
    %c0_i32_0 = arith.constant 0 : i32
    return %arg0, %c0_i32 : i32, i32
  }
  func.func @transform_12(%arg0: i32) -> (i32, i32, i32, i32) {
    %c0_i32 = arith.constant 0 : i32
    %c0_i32_0 = arith.constant 0 : i32
    %c0_i32_1 = arith.constant 0 : i32
    %c0_i32_2 = arith.constant 0 : i32
    return %arg0, %c0_i32, %c0_i32_0, %c0_i32_1 : i32, i32, i32, i32
  }
}

</mosaic_0001>

<bundles_post_ra>
// kernel: tpu_custom_call.1
= control target key start
LH: loop header
LB: loop body
LE: loop exit
PB: predicated region body
PF: predicated region fallthrough
CT: control target
= control target key end

     0   :  { %s2898_s0 = inlined_call_operand.hbm [shape: bf16[32,32], index: 0, kind: input, shape index: {}]   ;;  %s2899_s1 = inlined_call_operand.hbm [shape: bf16[32,32], index: 1, kind: input, shape index: {}]   ;;  %s2900_s2 = inlined_call_operand.hbm [shape: bf16[32,32], index: 2, kind: input, shape index: {}]   ;;  %s2901_s3 = inlined_call_operand.hbm [shape: bf16[32,32], index: 3, kind: input, shape index: {}]   ;;  %s2902_s4 = inlined_call_operand.vmem [shape: f32[1,32], index: 4, kind: input, shape index: {}]   ;;  %s2903_s5 = inlined_call_operand.vmem [shape: bf16[32,32], index: 5, kind: input, shape index: {}]   ;;  %s2904_s6 = inlined_call_operand.vmem [shape: f32[1,32], index: 6, kind: input, shape index: {}]   ;;  %s2905_s7 = inlined_call_operand.hbm [shape: bf16[32,32], index: 7, kind: input, shape index: {}]   ;;  %s2906_s8 = inlined_call_operand.hbm [shape: f32[1,32], index: 8, kind: input, shape index: {}]   ;;  %s2907_s9 = inlined_call_operand.vmem [shape: bf16[32,32], index: 9, kind: input, shape index: {}]   ;;  %s2908_s10 = inlined_call_operand.vmem [shape: f32[1,32], index: 10, kind: input, shape index: {}]   ;;  %s2909_s11 = inlined_call_operand.hbm [shape: f32[32,32], index: 11, kind: output, shape index: {0}]   ;;  %s2910_s12 = inlined_call_operand.hbm [shape: bf16[2,4,16,16], index: 12, kind: output, shape index: {1}]  }
   0x1   :  { %2939 = sst [smem:[#allocation32_spill]] %s2899_s1 }
   0x2   :  { %2940 = sst [smem:[#allocation33_spill]] %s2901_s3 }
   0x3   :  { %2941 = sst [smem:[#allocation34_spill]] %s2902_s4 }
   0x4   :  { %2942 = sst [smem:[#allocation35_spill]] %s2903_s5 }
   0x5   :  { %2943 = sst [smem:[#allocation36_spill]] %s2904_s6 }
   0x6   :  { %2944 = sst [smem:[#allocation37_spill]] %s2907_s9 }
   0x7   :  { %2945 = sst [smem:[#allocation38_spill]] %s2908_s10 }
   0x8   :  { %2946 = sst [smem:[#allocation39_spill]] %s2909_s11 }
   0x9   :  { %2947 = sst [smem:[#allocation40_spill]] %s2910_s12 }
   0xa   :  { %18 = vsyncpa [#allocation7], 0 }
   0xb   :  { %20 = vsyncpa [#allocation7 + $0x1], 0 }
   0xc   :  { %21 = vsyncpa [#allocation10], 0 }
   0xd   :  { %23 = vsyncpa [#allocation10 + $0x1], 0 }
   0xe   :  { %24 = vsyncpa [#allocation13], 0 }
   0xf   :  { %25 = vsyncpa [#allocation16], 0 }
  0x10   :  { %26 = vsyncpa [#allocation8], 0 }
  0x11   :  { %28 = vsyncpa [#allocation8 + $0x1], 0 }
  0x12   :  { %29 = vsyncpa [#allocation19], 0 }
  0x13   :  { %31 = vsyncpa [#allocation19 + $0x1], 0  ;;  %s2365_s21 = smov 0   ;;  %s2367_s22 = smov 0  }
  0x14   :  { %s2369_s23 = smov 0   ;;  %s2371_s24 = smov 0  }
  0x15 LB: > { %2948 = sst [smem:[#allocation26_spill]] %s2265_s21  ;;  %s2386_s25 = sadd.s32 4294967295, %s2277_s24   ;;  %s2277_s24 = sphi %s2371_s24, %s2994_s24   ;;  %s2273_s23 = sphi %s2369_s23, %s2998_s23   ;;  %s2269_s22 = sphi %s2367_s22, %s2997_s22   ;;  %s2265_s21 = sphi %s2365_s21, %s2996_s21  }
  0x16   : > { %2949 = sst [smem:[#allocation27_spill]] %s2277_s24  ;;  %s1636_s26 = sadd.s32 4294967294, %s2277_s24  }
  0x17   : > { %s2390_s27 = sadd.s32 1, %s2277_s24   ;;  %s44_s28 = sadd.s32 1, %s2273_s23 }
  0x18   : > { %2950 = sst [smem:[#allocation28_spill]] %s2390_s27  ;;  %s41_s29 = ssub.s32 %s2277_s24, %s2390_s27 }
  0x19   : > { %p51_p0 = scmp.ne.s32.totalorder %s2273_s23, %s2269_s22  ;;  %p42_p1 = scmp.eq.s32.totalorder %s41_s29, 0 }
  0x1a   : > { %p52_p2 = scmp.eq.s32.totalorder %s2277_s24, 0  ;;  %p57_p3 = scmp.ne.s32.totalorder %s2269_s22, %s2265_s21 }
  0x1b   : > { %p2917_p4 = scmp.eq.s32.totalorder %s2386_s25, 0  ;;  %p301_p7 = scmp.eq.s32.totalorder %s2386_s25, 1 }
  0x1c   : > { %s2402_s30 = scalar_select %p42_p1, %s2273_s23, %s44_s28  }
  0x1d   : > { %p2404_p5 = por %p52_p2, %p51_p0  ;;  %p2410_p6 = por %p2917_p4, %p57_p3 }
  0x1e   : > { %2951 = sst [smem:[#allocation29_spill]] %s2402_s30  ;;  %p307_p8 = scmp.eq.s32.totalorder %s1636_s26, 1 }
  0x1f   : > { %s2952_s13 = scalar_select %p2404_p5, 1, 0 }
  0x20   : > { %s2953_s14 = scalar_select %p2410_p6, 1, 0 }
  0x21   : > { %p1637_p9 = scmp.ge.s32.totalorder %s2277_s24, 1  ;;  %p340_p10 = scmp.lt.s32.totalorder %s2277_s24, 3 }
  0x22   : > { %p2417_p11 = por %p301_p7, %p51_p0  ;;  %p2421_p12 = por %p307_p8, %p57_p3 }
  0x23   : > { %p2425_p13 = pnand %p1637_p9, %p340_p10  ;;  %s2279_s18 = smov [#allocation12]  }
  0x24   : > { %s2954_s15 = scalar_select %p2417_p11, 1, 0 }
  0x25   : > { %s2956_s16 = scalar_select %p2421_p12, 1, 0 }
  0x26   : > { %2955 = sst [smem:[#allocation30_spill]] %s2954_s15  ;;  %p1852_p1 = pneg %p2425_p13 }
  0x27   : > { %2957 = sst [smem:[#allocation31_spill]] %s2956_s16  ;;  %s352_s19 = sshll.u32 %s2279_s18, 4  ;;  %s353_s19 = int_to_ptr.vmem [resolvable:$true] %s352_s19 }
  0x28   : > { %s2958_s17 = scalar_select %p2425_p13, 1, 0 }
  0x29   : > { %p2433_p2 = pnand %p1852_p1, %p2917_p4  ;;  %s2916_s26 = sand.u32 1, %s2273_s23  }
  0x2a   : > { %s2442_s28 = sshll.u32 %s2916_s26, 3  ;;  %s2960_s3 = sld [smem:[#allocation33_spill]] }
  0x2b   : > { %s2959_s20 = scalar_select %p2433_p2, 1, 0 }
  0x2c   : > { %p2452_p8 = pneg %p2433_p2 }
  0x2e   : > { %s2961_s18 = scalar_select %p2452_p8, 1, 0 }
  0x30   : > { %s1993_s27 = scalar_lea.hbm %s2960_s3, 256 }
  0x31   : > { %p1994_p7 = scmp.ne.s32.totalorder %s2960_s3, %s1993_s27  ;;  %p2000_p1 = scmp.lt.u32.totalorder %s1993_s27, %s2960_s3 }
  0x33   : > { %p1996_p9 = pnand %p2452_p8, %p1994_p7 }
  0x35   : > { %p1997_p10 = pneg %p1996_p9 }
  0x37   : > { %p2002_p0 = pnand %p2000_p1, %p1997_p10 }
  0x39   : > { %2005 = shalt.err (!%p2002_p0)
}
  0x3a   : > { %s2006_s30 = scalar_lea.vmem %s353_s19, 256  ;;  %p2014_p11 = scmp.lt.s32.totalorder %s353_s19, %s353_s19 }
  0x3b   : > { %p2007_p4 = scmp.ne.s32.totalorder %s353_s19, %s2006_s30  ;;  %p2015_p6 = scmp.lt.s32.totalorder %s2006_s30, %s2006_s30 }
  0x3d   : > { %p2009_p3 = pnand %p2007_p4, %p2452_p8  ;;  %p2016_p13 = por %p2015_p6, %p2014_p11 }
  0x3f   : > { %p2010_p12 = pneg %p2009_p3 }
  0x41   : > { %p2017_p5 = pnand %p2016_p13, %p2010_p12 }
  0x43   : > { %2020 = shalt.err (!%p2017_p5)
}
  0x44   : > { %s2924_s21 = smov 64   ;;  %s2926_s11 = smov 4  }
  0x45   : > { %1855 = dma.hbm_to_vmem [thread:$0]  (!%p2433_p2), %s2960_s3, 256, %s353_s19, [#allocation13], %s2924_s21, %s2924_s21, %s2926_s11  }
  0x46   : > { %s2472_s26 = sshll.u32 %s2277_s24, 7  ;;  %p2962_p4 = scmp.ne.s32.totalorder %s2952_s13, 0 }
  0x47   : > { %p2963_p5 = scmp.lt.s32.totalorder %s2277_s24, 2  ;;  %s426_s30 = sand.u32 1, %s2277_s24  }
  0x48   : > { %s2965_s1 = sld [smem:[#allocation32_spill]]  ;;  %s430_s19 = scalar_lea.vmem [#allocation9], %s2442_s28 }
  0x49   : > { %p2478_p6 = pnand %p2963_p5, %p2962_p4  ;;  %s437_s27 = sshll.u32 %s430_s19, 4  ;;  %s2490_s27 = int_to_ptr.vmem [resolvable:$true] %s437_s27 }
  0x4a   : > { %s2492_s13 = scalar_lea.sflag [#allocation10], %s426_s30 }
  0x4b   : > { %s2964_s29 = scalar_select %p2478_p6, 1, 0 }
  0x4c   : > { %p2498_p12 = pneg %p2478_p6 }
  0x4e   : > { %s2487_s15 = scalar_lea.hbm %s2965_s1, %s2472_s26  ;;  %s2026_s11 = scalar_lea.hbm %s2965_s1, 256 }
  0x4f   : > { %s2021_s16 = scalar_lea.hbm %s2487_s15, 128  ;;  %p2027_p3 = scmp.lt.u32.totalorder %s2487_s15, %s2965_s1 }
  0x50   : > { %p2022_p11 = scmp.ne.s32.totalorder %s2487_s15, %s2021_s16  ;;  %p2028_p7 = scmp.lt.u32.totalorder %s2026_s11, %s2021_s16 }
  0x51   : > { %s2966_s21 = scalar_select %p2498_p12, 1, 0 }
  0x52   : > { %p2024_p13 = pnand %p2498_p12, %p2022_p11  ;;  %p2029_p9 = por %p2028_p7, %p2027_p3 }
  0x53   : > { %p2030_p10 = scmp.lt.u32.totalorder %s2021_s16, %s2487_s15 }
  0x54   : > { %p2025_p0 = pneg %p2024_p13 }
  0x55   : > { %p2031_p1 = por %p2030_p10, %p2029_p9 }
  0x57   : > { %p2032_p4 = pnand %p2031_p1, %p2025_p0 }
  0x59   : > { %2035 = shalt.err (!%p2032_p4)
}
  0x5a   : > { %s2036_s30 = scalar_lea.vmem %s2490_s27, 128  ;;  %s2282_s10 = smov [#allocation9]  }
  0x5b   : > { %p2037_p5 = scmp.ne.s32.totalorder %s2490_s27, %s2036_s30  ;;  %s2041_s12 = sshll.u32 %s2282_s10, 4  ;;  %s2042_s12 = int_to_ptr.vmem [resolvable:$false] %s2041_s12 }
  0x5c   : > { %s2043_s3 = scalar_lea.vmem %s2042_s12, 256  ;;  %p2044_p2 = scmp.lt.s32.totalorder %s2490_s27, %s2042_s12 }
  0x5d   : > { %p2039_p11 = pnand %p2037_p5, %p2498_p12  ;;  %p2045_p8 = scmp.lt.s32.totalorder %s2043_s3, %s2036_s30 }
  0x5f   : > { %p2040_p13 = pneg %p2039_p11  ;;  %p2046_p3 = por %p2045_p8, %p2044_p2 }
  0x61   : > { %p2047_p7 = pnand %p2046_p3, %p2040_p13 }
  0x63   : > { %2050 = shalt.err (!%p2047_p7)
}
  0x64   : > { %s2967_s11 = smov 4   ;;  %s2968_s16 = smov 64  }
  0x65   : > { %1868 = dma.hbm_to_vmem [thread:$0]  (!%p2478_p6), %s2487_s15, 128, %s2490_s27, %s2492_s13, %s2968_s16, %s2968_s16, %s2967_s11  }
  0x66   : > { %s2283_s19 = smov [#allocation14]   ;;  %s2284_s10 = smov [#allocation15]  }
  0x67   : > { %s374_s1 = sshll.u32 %s2283_s19, 4  ;;  %s388_s24 = sshll.u32 %s2284_s10, 4  ;;  %s375_s1 = int_to_ptr.vmem [resolvable:$true] %s374_s1  ;;  %s389_s24 = int_to_ptr.vmem [resolvable:$true] %s388_s24 }
  0x68   : > { %s2051_s3 = scalar_lea.hbm %s2905_s7, 256  ;;  %p2969_p8 = scmp.ne.s32.totalorder %s2961_s18, 0 }
  0x69   : > { %p2052_p2 = scmp.ne.s32.totalorder %s2905_s7, %s2051_s3  ;;  %p2058_p10 = scmp.lt.u32.totalorder %s2051_s3, %s2905_s7 }
  0x6b   : > { %p2054_p0 = pnand %p2052_p2, %p2969_p8 }
  0x6d   : > { %p2055_p9 = pneg %p2054_p0 }
  0x6f   : > { %p2060_p1 = pnand %p2058_p10, %p2055_p9 }
  0x71   : > { %2063 = shalt.err (!%p2060_p1)
}
  0x72   : > { %s2064_s15 = scalar_lea.vmem %s375_s1, 256  ;;  %p2072_p13 = scmp.lt.s32.totalorder %s375_s1, %s375_s1 }
  0x73   : > { %p2065_p4 = scmp.ne.s32.totalorder %s375_s1, %s2064_s15  ;;  %p2073_p3 = scmp.lt.s32.totalorder %s2064_s15, %s2064_s15 }
  0x75   : > { %p2067_p5 = pnand %p2065_p4, %p2969_p8  ;;  %p2074_p7 = por %p2073_p3, %p2072_p13 }
  0x77   : > { %p2068_p11 = pneg %p2067_p5 }
  0x79   : > { %p2075_p6 = pnand %p2074_p7, %p2068_p11 }
  0x7b   : > { %2078 = shalt.err (!%p2075_p6)
}
  0x7c   : > { %p2970_p2 = scmp.ne.s32.totalorder %s2959_s20, 0  ;;  %s2079_s27 = scalar_lea.hbm %s2906_s8, 16 }
  0x7d   : > { %p2080_p0 = scmp.ne.s32.totalorder %s2906_s8, %s2079_s27  ;;  %p2086_p10 = scmp.lt.u32.totalorder %s2079_s27, %s2906_s8 }
  0x7e   : > { %1858 = dma.hbm_to_vmem [thread:$0]  (!%p2970_p2), %s2905_s7, 256, %s375_s1, [#allocation13], %s2968_s16, %s2968_s16, %s2967_s11  }
  0x7f   : > { %p2082_p6 = pnand %p2080_p0, %p2969_p8 }
  0x81   : > { %p2083_p9 = pneg %p2082_p6 }
  0x83   : > { %p2088_p1 = pnand %p2086_p10, %p2083_p9 }
  0x85   : > { %2091 = shalt.err (!%p2088_p1)
}
  0x86   : > { %s2092_s3 = scalar_lea.vmem %s389_s24, 16  ;;  %s2099_s1 = scalar_lea.vmem %s389_s24, 32 }
  0x87   : > { %p2093_p4 = scmp.ne.s32.totalorder %s389_s24, %s2092_s3  ;;  %p2100_p13 = scmp.lt.s32.totalorder %s389_s24, %s389_s24 }
  0x88   : > { %p2101_p3 = scmp.lt.s32.totalorder %s2099_s1, %s2092_s3 }
  0x89   : > { %p2095_p5 = pnand %p2093_p4, %p2969_p8 }
  0x8a   : > { %p2102_p7 = por %p2101_p3, %p2100_p13 }
  0x8b   : > { %p2096_p11 = pneg %p2095_p5 }
  0x8d   : > { %p2103_p12 = pnand %p2102_p7, %p2096_p11 }
  0x8f   : > { %2106 = shalt.err (!%p2103_p12)
}
  0x90   : > { %1861 = dma.hbm_to_vmem [thread:$0]  (!%p2970_p2), %s2906_s8, 16, %s389_s24, [#allocation16]  }
  0x91   : > { %s2568_s6 = scalar_lea.hbm %s2898_s0, %s2472_s26  ;;  %s409_s9 = scalar_lea.vmem [#allocation6], %s2442_s28 }
  0x92   : > { %s416_s20 = sshll.u32 %s409_s9, 4  ;;  %s2577_s10 = scalar_lea.hbm %s2900_s2, %s2472_s26  ;;  %s2571_s20 = int_to_ptr.vmem [resolvable:$true] %s416_s20 }
  0x93   : > { %s2971_s12 = sand.u32 1, %s2273_s23   ;;  %s2107_s30 = scalar_lea.hbm %s2568_s6, 128 }
  0x94   : > { %s2581_s24 = scalar_lea.sflag [#allocation7], %s2971_s12  ;;  %p2108_p12 = scmp.ne.s32.totalorder %s2568_s6, %s2107_s30 }
  0x95   : > { %p2972_p8 = scmp.ne.s32.totalorder %s2966_s21, 0  ;;  %s2112_s15 = scalar_lea.hbm %s2898_s0, 256 }
  0x96   : > { %p2113_p6 = scmp.lt.u32.totalorder %s2568_s6, %s2898_s0  ;;  %p2114_p9 = scmp.lt.u32.totalorder %s2112_s15, %s2107_s30 }
  0x97   : > { %p2110_p2 = pnand %p2108_p12, %p2972_p8  ;;  %p2116_p1 = scmp.lt.u32.totalorder %s2107_s30, %s2568_s6 }
  0x98   : > { %p2115_p10 = por %p2114_p9, %p2113_p6 }
  0x99   : > { %p2111_p0 = pneg %p2110_p2 }
  0x9a   : > { %p2117_p4 = por %p2116_p1, %p2115_p10 }
  0x9c   : > { %p2118_p5 = pnand %p2117_p4, %p2111_p0 }
  0x9e   : > { %2121 = shalt.err (!%p2118_p5)
}
  0x9f   : > { %s2122_s26 = scalar_lea.vmem %s2571_s20, 128  ;;  %s2285_s5 = smov [#allocation6]  }
  0xa0   : > { %p2123_p11 = scmp.ne.s32.totalorder %s2571_s20, %s2122_s26  ;;  %s2127_s9 = sshll.u32 %s2285_s5, 4  ;;  %s2128_s9 = int_to_ptr.vmem [resolvable:$false] %s2127_s9 }
  0xa1   : > { %s2129_s27 = scalar_lea.vmem %s2128_s9, 256  ;;  %p2130_p7 = scmp.lt.s32.totalorder %s2571_s20, %s2128_s9 }
  0xa2   : > { %p2125_p13 = pnand %p2123_p11, %p2972_p8  ;;  %p2131_p12 = scmp.lt.s32.totalorder %s2129_s27, %s2122_s26 }
  0xa4   : > { %p2126_p3 = pneg %p2125_p13  ;;  %p2132_p2 = por %p2131_p12, %p2130_p7 }
  0xa6   : > { %p2133_p6 = pnand %p2132_p2, %p2126_p3 }
  0xa8   : > { %2136 = shalt.err (!%p2133_p6)
}
  0xa9   : > { %p2973_p0 = scmp.ne.s32.totalorder %s2964_s29, 0  ;;  %s451_s19 = scalar_lea.vmem [#allocation11], %s2442_s28 }
  0xaa   : > { %s458_s12 = sshll.u32 %s451_s19, 4  ;;  %s2137_s30 = scalar_lea.hbm %s2577_s10, 128  ;;  %s2609_s12 = int_to_ptr.vmem [resolvable:$true] %s458_s12 }
  0xab   : > { %1865 = dma.hbm_to_vmem [thread:$0]  (!%p2973_p0), %s2568_s6, 128, %s2571_s20, %s2581_s24, %s2968_s16, %s2968_s16, %s2967_s11  }
  0xac   : > { %p2138_p9 = scmp.ne.s32.totalorder %s2577_s10, %s2137_s30  ;;  %s2142_s15 = scalar_lea.hbm %s2900_s2, 256 }
  0xad   : > { %p2143_p4 = scmp.lt.u32.totalorder %s2577_s10, %s2900_s2  ;;  %p2144_p5 = scmp.lt.u32.totalorder %s2142_s15, %s2137_s30 }
  0xae   : > { %p2140_p10 = pnand %p2138_p9, %p2972_p8  ;;  %p2146_p13 = scmp.lt.u32.totalorder %s2137_s30, %s2577_s10 }
  0xaf   : > { %p2145_p11 = por %p2144_p5, %p2143_p4 }
  0xb0   : > { %p2141_p1 = pneg %p2140_p10 }
  0xb1   : > { %p2147_p3 = por %p2146_p13, %p2145_p11 }
  0xb3   : > { %p2148_p7 = pnand %p2147_p3, %p2141_p1 }
  0xb5   : > { %2151 = shalt.err (!%p2148_p7)
}
  0xb6   : > { %s2152_s28 = scalar_lea.vmem %s2609_s12, 128  ;;  %s2286_s6 = smov [#allocation11]  }
  0xb7   : > { %p2153_p12 = scmp.ne.s32.totalorder %s2609_s12, %s2152_s28  ;;  %s2157_s20 = sshll.u32 %s2286_s6, 4  ;;  %s2158_s20 = int_to_ptr.vmem [resolvable:$false] %s2157_s20 }
  0xb8   : > { %s2159_s24 = scalar_lea.vmem %s2158_s20, 256  ;;  %p2160_p9 = scmp.lt.s32.totalorder %s2609_s12, %s2158_s20 }
  0xb9   : > { %p2155_p2 = pnand %p2153_p12, %p2972_p8  ;;  %p2161_p10 = scmp.lt.s32.totalorder %s2159_s24, %s2152_s28 }
  0xbb   : > { %p2156_p6 = pneg %p2155_p2  ;;  %p2162_p4 = por %p2161_p10, %p2160_p9 }
  0xbd   : > { %p2163_p5 = pnand %p2162_p4, %p2156_p6 }
  0xbf   : > { %2166 = shalt.err (!%p2163_p5)
}
  0xc0   : > { %1871 = dma.hbm_to_vmem [thread:$0]  (!%p2973_p0), %s2577_s10, 128, %s2609_s12, %s2492_s13, %s2968_s16, %s2968_s16, %s2967_s11  }
  0xc1   : > { %p2974_p8 = scmp.ne.s32.totalorder %s2958_s17, 0 }
  0xc2   : > { %s2639_s21 = sand.u32 (!%p2974_p8), 1, %s2269_s22   ;;  %p2975_p1 = scmp.ne.s32.totalorder (!%p2974_p8), %s2953_s14, 0 }
  0xc3   : > { %470 = sbr.rel (%p2974_p8) target bundleno = 1698 (0x6a2), region = 64  ;;  %s2642_s26 = sshll.u32 (!%p2974_p8), %s2639_s21, 3 }
  0xc4   : > { %s473_s29 = scalar_lea.sflag (!%p2974_p8), [#allocation7], %s2639_s21  ;;  %s476_s5 = scalar_lea.vmem (!%p2974_p8), [#allocation6], %s2642_s26 }
  0xca   : > { %2240 = dma.done.wait (%p2975_p1), %s473_s29, 128  }
  0xcb   : > { %2242 = vsyncadd (%p2975_p1), %s473_s29, 4294967168  ;;  %s481_s17 = sand.u32 1, %s2386_s25   ;;  %s485_s11 = scalar_lea.vmem [#allocation9], %s2642_s26 }
  0xcc   : > { %s482_s13 = scalar_lea.sflag [#allocation10], %s481_s17 }
  0xcd   : > { %2244 = dma.done.wait (%p2975_p1), %s482_s13, 256  }
  0xce   : > { %2246 = vsyncadd (%p2975_p1), %s482_s13, 4294967040  ;;  %s494_s16 = scalar_lea.vmem [#allocation11], %s2642_s26  ;;  %p2976_p0 = scmp.eq.s32.totalorder %s2386_s25, 0 }
  0xd0   : > { %2248 = dma.done.wait (%p2976_p0), [#allocation13], 512   ;;  %p2977_p11 = pmov %p2976_p0 }
  0xd1   : > { %p2978_p13 = pmov %p2976_p0 }
  0xd2   : > { %2250 = vsyncadd (%p2977_p11), [#allocation13], 4294966784 }
  0xd3   : > { %2252 = dma.done.wait (%p2978_p13), [#allocation16], 16   ;;  %p2979_p3 = pmov %p2976_p0 }
  0xd4   : > { %v2287_v0 = vmov 0.0   ;;  %vm2288_vm0 = vmmov 0   ;;  %s2980_s9 = sld [smem:[#allocation35_spill]]  ;;  %v1951_v2 = vld [vmem:[#allocation12] sm:$0xff]   ;;  %v1954_v4 = vld [vmem:[#allocation12 + $0x8] sm:$0xff]   ;;  %vm612_vm1 = vcmask 261120  }
  0xd5   : > { %2254 = vsyncadd (%p2979_p3), [#allocation16], 4294967280  ;;  %1758 = vmatprep.subr.bf16.mxu1 %v2287_v0  ;;  %1750 = vmatprep.subr.bf16.mxu0 %v2287_v0  ;;  %v1953_v5 = vld [vmem:[%s485_s11] sm:$0xff]   ;;  %v1955_v6 = vld [vmem:[%s476_s5] sm:$0xff]   ;;  %s2981_s3 = sld [smem:[#allocation34_spill]]  ;;  %s2982_s4 = sld [smem:[#allocation36_spill]] }
  0xd6   : > { %1762 = vmatprep.mubr.msk.bf16.mxu1 %vm2288_vm0, %v2287_v0  ;;  %1754 = vmatprep.mubr.msk.bf16.mxu0 %vm2288_vm0, %v2287_v0  ;;  %vm804_vm2 = vcmask 64512   ;;  %s2289_s18 = smov 112   ;;  %s2290_s28 = smov 120   ;;  %v1956_v26 = vld [vmem:[#allocation14] sm:$0xff]   ;;  %v1957_v27 = vld [vmem:[#allocation14 + $0x8] sm:$0xff]   ;;  %vm852_vm3 = vcmask 130048  }
  0xd7   : > { %1751 = vmatpush3.bf16.msra.mxu0 %v1951_v2  ;;  %s2291_s6 = smov 104   ;;  %v1958_v28 = vld [vmem:[%s494_s16] sm:$0xff]   ;;  %v1670_v44 = vld [vmem:[#allocation15] ss:$0 sm:$0xff]  ;;  %s1659_s20 = sshll.u32 %s2639_s21, 5  ;;  %vm883_vm4 = vcmask 125952  }
  0xd8   : > { %1752 = vmatprep.subr.bf16.mxu0 %v2287_v0  ;;  %s2762_s24 = scalar_lea.vmem [#allocation18], %s1659_s20  ;;  %s2292_s26 = smov 8   ;;  %vm1354_vm5 = vcmask 195584  }
  0xd9   : > { %s2293_s29 = smov 16   ;;  %s2983_s13 = sld [smem:[#allocation37_spill]] }
  0xda   : > { %v1950_v1 = vld [vmem:[%s2980_s9] sm:$0xff]   ;;  %v1952_v3 = vld [vmem:[%s2980_s9 + $0x8] sm:$0xff]   ;;  %s2294_s14 = smov 24   ;;  %s2984_s10 = sld [smem:[#allocation30_spill]] }
  0xdb   : > { %1759 = vmatpush3.bf16.msra.mxu1 %v1950_v1  ;;  %1753 = vmatpush3.bf16.msra.mxu0 %v1954_v4  ;;  %v1660_v7 = vld [vmem:[%s2981_s3] ss:$0 sm:$0xff]  ;;  %s1721_s27 = sshll.u32 %s2386_s25, 9  ;;  %s2985_s30 = sld [smem:[#allocation40_spill]] }
  0xdc   : > { %1760 = vmatprep.subr.bf16.mxu1 %v2287_v0  ;;  %1766 = vmatprep.subr.bf16.mxu0 %v2287_v0  ;;  %v1665_v8 = vld [vmem:[%s2982_s4] ss:$0 sm:$0xff]  ;;  %s1459_s1 = sshll.u32 %s2762_s24, 4  ;;  %s1430_s15 = scalar_lea.sflag [#allocation19], %s2639_s21  ;;  %s2815_s1 = int_to_ptr.vmem [resolvable:$true] %s1459_s1 }
  0xdd   : > { %s2167_s4 = scalar_lea.vmem %s2815_s1, 512 }
  0xde   : > { %1755 = vmatmul.mubr.msk.bf16.vlgmr.msra.gmra.mrb[0].mxu0 %vm612_vm1, %v1955_v6  ;;  %p2168_p7 = scmp.ne.s32.totalorder %s2815_s1, %s2167_s4 }
  0xdf   : > { %1761 = vmatpush3.bf16.msra.mxu1 %v1952_v3  ;;  %1770 = vmatprep.mubr.msk.bf16.mxu0 %vm2288_vm0, %v2287_v0 }
  0xe0   : > { %1774 = vmatprep.subr.bf16.mxu1 %v2287_v0  ;;  %1767 = vmatpush3.bf16.msra.mxu0 %v1956_v26  ;;  %p2986_p12 = scmp.ne.s32.totalorder %s2984_s10, 0 }
  0xe1   : > { %1768 = vmatprep.subr.bf16.mxu0 %v2287_v0  ;;  %s2812_s3 = scalar_lea.hbm %s2985_s30, %s1721_s27 }
  0xe2   : > { %1763 = vmatmul.mubr.msk.bf16.vlgmr.msra.gmra.mrb[0].mxu1 %vm612_vm1, %v1953_v5  ;;  %p2169_p2 = pnand %p2168_p7, %p2986_p12 }
  0xe3   : > { %1776 = vmatprep.mubr.msk.bf16.mxu1 %vm2288_vm0, %v2287_v0 }
  0xe4   : > { %1769 = vmatpush3.bf16.msra.mxu0 %v1957_v27  ;;  %p2170_p6 = pneg %p2169_p2 }
  0xe5   : > { %1780 = vmatprep.subr.bf16.mxu0 %v2287_v0 }
  0xe7   : > { %1771 = vmatmul.mubr.msk.bf16.vlgmr.msra.gmra.mrb[4].mxu0 %vm612_vm1, %v1958_v28 }
  0xe8   : > { %1782 = vmatprep.mubr.msk.bf16.mxu0 %vm2288_vm0, %v2287_v0 }
 0x1b1   : > { %v650_v11 = vpop.f32.mrb[0].mxu0 }
 0x1b2   : > { %v651_v13 = vadd.f32 %v1660_v7, %v650_v11  ;;  %v1756_v14 = vpop.f32.mrb[1].mxu0 }
 0x1b3   : > { %v653_v18 = vpop.f32.mrb[2].mxu0 }
 0x1b4   : > { %v654_v19 = vadd.f32 %v1660_v7, %v653_v18  ;;  %v1757_v20 = vpop.f32.mrb[3].mxu0 }
 0x1b5   : > { %v719_v9 = vpop.f32.mrb[0].mxu1 }
 0x1b6   : > { %v1764_v10 = vpop.f32.mrb[1].mxu1  ;;  %v720_v15 = vadd.f32 %v1665_v8, %v719_v9  ;;  %v795_v22 = vpack.c.bf16 %v654_v19, %v651_v13 }
 0x1b7   : > { %v722_v12 = vpop.f32.mrb[2].mxu1 }
 0x1b8   : > { %v723_v16 = vadd.f32 %v1665_v8, %v722_v12  ;;  %v1765_v17 = vpop.f32.mrb[3].mxu1  ;;  %796 = vst.msk [vmem:[#allocation2] sm:$0xff] %vm612_vm1, %v795_v22 }
 0x1ba   : > { %v797_v21 = vpack.c.bf16 %v723_v16, %v720_v15  ;;  %v788_v45 = vpop.f32.mrb[4].mxu0 }
 0x1bb   : > { %v789_v46 = vadd.f32 %v1670_v44, %v788_v45  ;;  %v1772_v47 = vpop.f32.mrb[5].mxu0 }
 0x1bc   : > { %798 = vst.msk [vmem:[#allocation3] sm:$0xff] %vm612_vm1, %v797_v21  ;;  %v791_v48 = vpop.f32.mrb[6].mxu0 }
 0x1bd   : > { %v792_v49 = vadd.f32 %v1670_v44, %v791_v48  ;;  %v1773_v50 = vpop.f32.mrb[7].mxu0 }
 0x1bf   : > { %v801_v25 = vld [vmem:[#allocation2] sm:$0xff]  ;;  %v799_v51 = vpack.c.bf16 %v792_v49, %v789_v46 }
 0x1c1   : > { %800 = vst.msk [vmem:[#allocation4] sm:$0xff] %vm612_vm1, %v799_v51 }
 0x1c3   : > { %v802_v23 = vld [vmem:[#allocation3] sm:$0xff] }
 0x1c4   : > { %1066 = vrot.lane.b32.xlu1 %v802_v23, %s2289_s18  ;;  %934 = vrot.lane.b32.xlu0 %v802_v23, %s2290_s28  ;;  %v809_v24 = vsel %vm804_vm2, %v802_v23, 0 }
 0x1c5   : > { %1775 = vmatpush3.bf16.xpose.msra.mxu1 %v809_v24 }
 0x1c6   : > { %1786 = vmatprep.subr.bf16.mxu1 %v2287_v0 }
 0x1c8   : > { %1064 = vrot.lane.b32.xlu1 %v801_v25, %s2289_s18  ;;  %931 = vrot.lane.b32.xlu0 %v801_v25, %s2290_s28  ;;  %v2731_v52 = vld [vmem:[#allocation4] sm:$0xff] }
 0x1c9   : > { %1781 = vmatpush3.bf16.msra.mxu0 %v2731_v52 }
 0x1ca   : > { %1792 = vmatprep.subr.bf16.mxu0 %v2287_v0 }
 0x1cc   : > { %1195 = vrot.lane.b32.xlu1 %v801_v25, %s2291_s6  ;;  %1197 = vrot.lane.b32.xlu0 %v802_v23, %s2291_s6 }
 0x1cd   : > { %1777 = vmatmul.mubr.msk.bf16.vlgmr.msra.gmra.mrb[4].mxu1 %vm804_vm2, %v801_v25 }
 0x1ce   : > { %1788 = vmatprep.mubr.msk.bf16.mxu1 %vm2288_vm0, %v2287_v0 }
 0x236   : > { %v935_v29 = vpop.permute.xlu0 %934  ;;  %v1067_v31 = vpop.permute.xlu1 %1066 }
 0x237   : > { %v940_v30 = vsel %vm804_vm2, %v935_v29, 0  ;;  %v1072_v33 = vsel %vm804_vm2, %v1067_v31, 0 }
 0x238   : > { %1787 = vmatpush3.bf16.xpose.msra.mxu1 %v940_v30 }
 0x239   : > { %1798 = vmatprep.subr.bf16.mxu1 %v2287_v0 }
 0x23a   : > { %v932_v32 = vpop.permute.xlu0 %931  ;;  %v1065_v35 = vpop.permute.xlu1 %1064 }
 0x23e   : > { %v1198_v34 = vpop.permute.xlu0 %1197  ;;  %v1196_v37 = vpop.permute.xlu1 %1195 }
 0x23f   : > { %1789 = vmatmul.mubr.msk.bf16.vlgmr.msra.gmra.mrb[8].mxu1 %vm804_vm2, %v932_v32  ;;  %v1203_v36 = vsel %vm804_vm2, %v1198_v34, 0 }
 0x240   : > { %1799 = vmatpush3.bf16.xpose.msra.mxu1 %v1072_v33  ;;  %1800 = vmatprep.mubr.msk.bf16.mxu1 %vm2288_vm0, %v2287_v0 }
 0x241   : > { %1810 = vmatprep.subr.bf16.mxu1 %v2287_v0 }
 0x247   : > { %1801 = vmatmul.mubr.msk.bf16.vlgmr.msra.gmra.mrb[12].mxu1 %vm804_vm2, %v1065_v35 }
 0x248   : > { %1811 = vmatpush3.bf16.xpose.msra.mxu1 %v1203_v36  ;;  %1812 = vmatprep.mubr.msk.bf16.mxu1 %vm2288_vm0, %v2287_v0 }
 0x249   : > { %1822 = vmatprep.subr.bf16.mxu1 %v2287_v0 }
 0x24f   : > { %1813 = vmatmul.mubr.msk.bf16.vlgmr.msra.gmra.mrb[16].mxu1 %vm804_vm2, %v1196_v37 }
 0x250   : > { %1826 = vmatprep.mubr.msk.bf16.mxu1 %vm2288_vm0, %v2287_v0 }
 0x2a0   : > { %v845_v38 = vpop.f32.mrb[4].mxu1 }
 0x2a1   : > { %v1778_v39 = vpop.f32.mrb[5].mxu1  ;;  %v853_v40 = vsel %vm852_vm3, %v845_v38, -inf }
 0x2a2   : > { %854 = vmax.xlane.f32.xlu0 %v853_v40  ;;  %v848_v41 = vpop.f32.mrb[6].mxu1 }
 0x2a3   : > { %v1779_v42 = vpop.f32.mrb[7].mxu1  ;;  %v856_v43 = vsel %vm852_vm3, %v848_v41, -inf }
 0x2a4   : > { %857 = vmax.xlane.f32.xlu1 %v856_v43 }
 0x312   : > { %v976_v53 = vpop.f32.mrb[8].mxu1 }
 0x313   : > { %v1790_v54 = vpop.f32.mrb[9].mxu1  ;;  %v983_v55 = vsel %vm852_vm3, %v976_v53, -inf }
 0x314   : > { %984 = vmax.xlane.f32.xlu0 %v983_v55  ;;  %v979_v56 = vpop.f32.mrb[10].mxu1 }
 0x315   : > { %v1791_v57 = vpop.f32.mrb[11].mxu1  ;;  %v986_v58 = vsel %vm852_vm3, %v979_v56, -inf }
 0x318   : > { %987 = vmax.xlane.f32.xlu0 %v986_v58 }
 0x31a   : > { %v1108_v59 = vpop.f32.mrb[12].mxu1 }
 0x31b   : > { %v1802_v60 = vpop.f32.mrb[13].mxu1  ;;  %v1115_v61 = vsel %vm852_vm3, %v1108_v59, -inf }
 0x31c   : > { %1116 = vmax.xlane.f32.xlu1 %v1115_v61  ;;  %v1111_v62 = vpop.f32.mrb[14].mxu1 }
 0x31d   : > { %v1803_v63 = vpop.f32.mrb[15].mxu1  ;;  %v1118_v1 = vsel %vm852_vm3, %v1111_v62, -inf }
 0x31e   : > { %1119 = vmax.xlane.f32.xlu0 %v1118_v1 }
 0x322   : > { %v1239_v2 = vpop.f32.mrb[16].mxu1 }
 0x323   : > { %v1814_v3 = vpop.f32.mrb[17].mxu1  ;;  %v1246_v4 = vsel %vm852_vm3, %v1239_v2, -inf }
 0x324   : > { %1247 = vmax.xlane.f32.xlu1 %v1246_v4  ;;  %v1242_v5 = vpop.f32.mrb[18].mxu1 }
 0x325   : > { %v1815_v6 = vpop.f32.mrb[19].mxu1  ;;  %v1249_v7 = vsel %vm852_vm3, %v1242_v5, -inf }
 0x326   : > { %1250 = vmax.xlane.f32.xlu0 %v1249_v7 }
 0x32f   : > { %v855_v8 = vpop.xlane.xlu0 %854 }
 0x330   : > { %v859_v9 = vsub.f32 %v845_v38, %v855_v8 }
 0x331   : > { %v858_v10 = vpop.xlane.xlu1 %857 }
 0x332   : > { %v861_v11 = vmul.f32 1.442695, %v859_v9  ;;  %v860_v12 = vsub.f32 %v848_v41, %v858_v10 }
 0x334   : > { %1961 = vpow2.f32 %v861_v11  ;;  %v863_v13 = vmul.f32 1.442695, %v860_v12 }
 0x336   : > { %1963 = vpow2.f32 %v863_v13 }
 0x33e   : > { %v1962_v14 = vpop.eup %1961 }
 0x33f   : > { %v865_v15 = vsel %vm852_vm3, %v1962_v14, 0.0 }
 0x340   : > { %v1964_v16 = vpop.eup %1963  ;;  %866 = vadd.xlane.f32.xlu1 %v865_v15 }
 0x341   : > { %v868_v17 = vsel %vm852_vm3, %v1964_v16, 0.0 }
 0x342   : > { %869 = vadd.xlane.f32.xlu0 %v868_v17 }
 0x351   : > { %1017 = vrot.lane.b32.xlu1 %v2731_v52, %s2290_s28 }
 0x3a1   : > { %v985_v18 = vpop.xlane.xlu0 %984 }
 0x3a2   : > { %v989_v19 = vsub.f32 %v976_v53, %v985_v18 }
 0x3a4   : > { %v991_v20 = vmul.f32 1.442695, %v989_v19 }
 0x3a5   : > { %v988_v21 = vpop.xlane.xlu0 %987 }
 0x3a6   : > { %1965 = vpow2.f32 %v991_v20  ;;  %v990_v22 = vsub.f32 %v979_v56, %v988_v21 }
 0x3a8   : > { %v993_v23 = vmul.f32 1.442695, %v990_v22 }
 0x3a9   : > { %v1117_v24 = vpop.xlane.xlu1 %1116 }
 0x3aa   : > { %1967 = vpow2.f32 %v993_v23  ;;  %v1121_v25 = vsub.f32 %v1108_v59, %v1117_v24 }
 0x3ab   : > { %v1120_v26 = vpop.xlane.xlu0 %1119 }
 0x3ac   : > { %v1123_v27 = vmul.f32 1.442695, %v1121_v25  ;;  %v1122_v28 = vsub.f32 %v1111_v62, %v1120_v26 }
 0x3ae   : > { %1969 = vpow2.f32 %v1123_v27  ;;  %v1125_v29 = vmul.f32 1.442695, %v1122_v28 }
 0x3b0   : > { %v1966_v30 = vpop.eup %1965  ;;  %1971 = vpow2.f32 %v1125_v29 }
 0x3b1   : > { %v1248_v31 = vpop.xlane.xlu1 %1247  ;;  %v995_v32 = vsel %vm852_vm3, %v1966_v30, 0.0 }
 0x3b2   : > { %v1252_v33 = vsub.f32 %v1239_v2, %v1248_v31  ;;  %996 = vadd.xlane.f32.xlu1 %v995_v32 }
 0x3b3   : > { %v1251_v34 = vpop.xlane.xlu0 %1250 }
 0x3b4   : > { %v1968_v35 = vpop.eup %1967  ;;  %v1254_v36 = vmul.f32 1.442695, %v1252_v33  ;;  %v1253_v37 = vsub.f32 %v1242_v5, %v1251_v34 }
 0x3b5   : > { %v998_v38 = vsel %vm852_vm3, %v1968_v35, 0.0 }
 0x3b6   : > { %1973 = vpow2.f32 %v1254_v36  ;;  %v1256_v39 = vmul.f32 1.442695, %v1253_v37  ;;  %999 = vadd.xlane.f32.xlu0 %v998_v38  ;;  %v1959_v38 = vld [vmem:[%s2983_s13] sm:$0xff]  }
 0x3b7   : > { %1823 = vmatpush3.bf16.msra.mxu1 %v1959_v38 }
 0x3b8   : > { %v1970_v40 = vpop.eup %1969  ;;  %1975 = vpow2.f32 %v1256_v39  ;;  %v1960_v39 = vld [vmem:[%s2983_s13 + $0x8] sm:$0xff]   ;;  %1824 = vmatprep.subr.bf16.mxu1 %v2287_v0 }
 0x3b9   : > { %v1127_v41 = vsel %vm852_vm3, %v1970_v40, 0.0 }
 0x3ba   : > { %v1972_v42 = vpop.eup %1971  ;;  %1128 = vadd.xlane.f32.xlu1 %v1127_v41 }
 0x3bb   : > { %v1130_v43 = vsel %vm852_vm3, %v1972_v42, 0.0  ;;  %1825 = vmatpush3.bf16.msra.mxu1 %v1960_v39 }
 0x3bc   : > { %1131 = vadd.xlane.f32.xlu0 %v1130_v43 }
 0x3c0   : > { %v2749_v44 = vpop.eup %1973 }
 0x3c1   : > { %v1258_v45 = vsel %vm852_vm3, %v2749_v44, 0.0 }
 0x3c2   : > { %v2753_v46 = vpop.eup %1975  ;;  %1259 = vadd.xlane.f32.xlu1 %v1258_v45 }
 0x3c3   : > { %v1261_v47 = vsel %vm852_vm3, %v2753_v46, 0.0 }
 0x3c4   : > { %1262 = vadd.xlane.f32.xlu0 %v1261_v47 }
 0x3cd   : > { %v867_v48 = vpop.xlane.xlu1 %866 }
 0x3ce   : > { %1977 = vrcp.f32 %v867_v48 }
 0x3cf   : > { %v870_v49 = vpop.xlane.xlu0 %869 }
 0x3d0   : > { %1979 = vrcp.f32 %v870_v49 }
 0x3d1   : > { %v1018_v58 = vpop.permute.xlu1 %1017 }
 0x3d3   : > { %1279 = vrot.lane.b32.xlu1 %v2731_v52, %s2291_s6 }
 0x3d8   : > { %v1978_v50 = vpop.eup %1977 }
 0x3d9   : > { %v873_v51 = vmul.f32 %v1978_v50, %v1962_v14 }
 0x3da   : > { %v1980_v53 = vpop.eup %1979  ;;  %1148 = vrot.lane.b32.xlu0 %v2731_v52, %s2289_s18  ;;  %s2295_s18 = smov [#allocation18]  }
 0x3db   : > { %v1712_v54 = vpack.c.bf16 %v873_v51, %v873_v51  ;;  %v874_v55 = vmul.f32 %v1980_v53, %v1964_v16  ;;  %s2171_s28 = sshll.u32 %s2295_s18, 4  ;;  %s2172_s28 = int_to_ptr.vmem [resolvable:$false] %s2171_s28 }
 0x3dc   : > { %s2173_s6 = scalar_lea.vmem %s2172_s28, 1024  ;;  %p2174_p9 = scmp.lt.s32.totalorder %s2815_s1, %s2172_s28 }
 0x3dd   : > { %884 = vst.msk [vmem:[%s2762_s24] sm:$0xf] %vm883_vm4, %v1712_v54  ;;  %v1713_v56 = vpack.c.bf16 %v874_v55, %v874_v55  ;;  %v875_v57 = vpack.c.bf16 %v874_v55, %v873_v51  ;;  %p2175_p10 = scmp.lt.s32.totalorder %s2173_s6, %s2167_s4 }
 0x3df   : > { %885 = vst.msk [vmem:[%s2762_s24 + $0x4] sm:$0xf] %vm883_vm4, %v1713_v56  ;;  %1783 = vmatmul.mubr.msk.bf16.vlgmr.msra.gmra.mrb[8].mxu0 %vm852_vm3, %v875_v57  ;;  %p2176_p4 = por %p2175_p10, %p2174_p9 }
 0x3e0   : > { %1793 = vmatpush3.bf16.msra.mxu0 %v1018_v58  ;;  %1794 = vmatprep.mubr.msk.bf16.mxu0 %vm2288_vm0, %v2287_v0 }
 0x3e1   : > { %1804 = vmatprep.subr.bf16.mxu0 %v2287_v0  ;;  %p2177_p5 = pnand %p2176_p4, %p2170_p6 }
 0x43f   : > { %v997_v52 = vpop.xlane.xlu1 %996 }
 0x440   : > { %1981 = vrcp.f32 %v997_v52 }
 0x443   : > { %v1000_v59 = vpop.xlane.xlu0 %999 }
 0x444   : > { %1983 = vrcp.f32 %v1000_v59 }
 0x447   : > { %v1129_v60 = vpop.xlane.xlu1 %1128 }
 0x448   : > { %1985 = vrcp.f32 %v1129_v60 }
 0x449   : > { %v1132_v61 = vpop.xlane.xlu0 %1131 }
 0x44a   : > { %v1982_v62 = vpop.eup %1981  ;;  %1987 = vrcp.f32 %v1132_v61 }
 0x44b   : > { %v1003_v63 = vmul.f32 %v1982_v62, %v1966_v30 }
 0x44d   : > { %v1714_v1 = vpack.c.bf16 %v1003_v63, %v1003_v63 }
 0x44e   : > { %v1984_v2 = vpop.eup %1983 }
 0x44f   : > { %1682 = vst.msk [vmem:[%s2762_s24 + $0x8] sm:$0xf] %vm883_vm4, %v1714_v1  ;;  %v1004_v3 = vmul.f32 %v1984_v2, %v1968_v35  ;;  %v1260_v4 = vpop.xlane.xlu1 %1259 }
 0x450   : > { %1989 = vrcp.f32 %v1260_v4 }
 0x451   : > { %v1715_v5 = vpack.c.bf16 %v1004_v3, %v1004_v3  ;;  %v1263_v6 = vpop.xlane.xlu0 %1262  ;;  %v1005_v7 = vpack.c.bf16 %v1004_v3, %v1003_v63 }
 0x452   : > { %v1986_v8 = vpop.eup %1985  ;;  %1991 = vrcp.f32 %v1263_v6 }
 0x453   : > { %1683 = vst.msk [vmem:[%s2762_s24 + $0xc] sm:$0xf] %vm883_vm4, %v1715_v5  ;;  %v1135_v9 = vmul.f32 %v1986_v8, %v1970_v40  ;;  %1795 = vmatmul.mubr.msk.bf16.vlgmr.msra.gmra.mrb[12].mxu0 %vm852_vm3, %v1005_v7  ;;  %v1280_v18 = vpop.permute.xlu1 %1279 }
 0x454   : > { %v1988_v10 = vpop.eup %1987  ;;  %1806 = vmatprep.mubr.msk.bf16.mxu0 %vm2288_vm0, %v2287_v0 }
 0x455   : > { %v1716_v11 = vpack.c.bf16 %v1135_v9, %v1135_v9  ;;  %v1136_v12 = vmul.f32 %v1988_v10, %v1972_v42  ;;  %v1149_v13 = vpop.permute.xlu0 %1148 }
 0x456   : > { %1805 = vmatpush3.bf16.msra.mxu0 %v1149_v13 }
 0x457   : > { %1688 = vst.msk [vmem:[%s2762_s24 + $0x10] sm:$0xf] %vm883_vm4, %v1716_v11  ;;  %v1717_v14 = vpack.c.bf16 %v1136_v12, %v1136_v12  ;;  %1816 = vmatprep.subr.bf16.mxu0 %v2287_v0  ;;  %v1137_v15 = vpack.c.bf16 %v1136_v12, %v1135_v9 }
 0x459   : > { %1689 = vst.msk [vmem:[%s2762_s24 + $0x14] sm:$0xf] %vm883_vm4, %v1717_v14 }
 0x45a   : > { %v1990_v16 = vpop.eup %1989 }
 0x45b   : > { %v1266_v17 = vmul.f32 %v1990_v16, %v2749_v44  ;;  %1807 = vmatmul.mubr.msk.bf16.vlgmr.msra.gmra.mrb[16].mxu0 %vm852_vm3, %v1137_v15 }
 0x45c   : > { %v1992_v19 = vpop.eup %1991  ;;  %1817 = vmatpush3.bf16.msra.mxu0 %v1280_v18  ;;  %1818 = vmatprep.mubr.msk.bf16.mxu0 %vm2288_vm0, %v2287_v0 }
 0x45d   : > { %v1718_v20 = vpack.c.bf16 %v1266_v17, %v1266_v17  ;;  %v1267_v21 = vmul.f32 %v1992_v19, %v2753_v46 }
 0x45f   : > { %1694 = vst.msk [vmem:[%s2762_s24 + $0x18] sm:$0xf] %vm883_vm4, %v1718_v20  ;;  %v1719_v22 = vpack.c.bf16 %v1267_v21, %v1267_v21  ;;  %v1268_v23 = vpack.c.bf16 %v1267_v21, %v1266_v17 }
 0x461   : > { %1695 = vst.msk [vmem:[%s2762_s24 + $0x1c] sm:$0xf] %vm883_vm4, %v1719_v22 }
 0x463   : > { %1819 = vmatmul.mubr.msk.bf16.vlgmr.msra.gmra.mrb[20].mxu0 %vm852_vm3, %v1268_v23 }
 0x4b2   : > { %v923_v24 = vpop.f32.mrb[8].mxu0 }
 0x4b3   : > { %v1784_v25 = vpop.f32.mrb[9].mxu0 }
 0x4b4   : > { %v926_v26 = vpop.f32.mrb[10].mxu0 }
 0x4b5   : > { %v1785_v27 = vpop.f32.mrb[11].mxu0 }
 0x526   : > { %v1057_v28 = vpop.f32.mrb[12].mxu0 }
 0x527   : > { %v1796_v29 = vpop.f32.mrb[13].mxu0 }
 0x528   : > { %v1060_v30 = vpop.f32.mrb[14].mxu0 }
 0x529   : > { %v1935_v31 = vpack.i.bf16 %v1060_v30, %v1057_v28  ;;  %v1797_v32 = vpop.f32.mrb[15].mxu0 }
 0x52b   : > { %1936 = vrot.lane.b32.xlu1 %v1935_v31, %s2292_s26 }
 0x52e   : > { %v1188_v33 = vpop.f32.mrb[16].mxu0 }
 0x52f   : > { %v1808_v34 = vpop.f32.mrb[17].mxu0 }
 0x530   : > { %v1191_v35 = vpop.f32.mrb[18].mxu0 }
 0x531   : > { %v1940_v36 = vpack.i.bf16 %v1191_v35, %v1188_v33  ;;  %v1809_v37 = vpop.f32.mrb[19].mxu0 }
 0x533   : > { %1941 = vrot.lane.b32.xlu0 %v1940_v36, %s2293_s29 }
 0x536   : > { %v1319_v40 = vpop.f32.mrb[20].mxu0 }
 0x537   : > { %v1820_v41 = vpop.f32.mrb[21].mxu0 }
 0x538   : > { %v1322_v42 = vpop.f32.mrb[22].mxu0 }
 0x539   : > { %v1945_v43 = vpack.i.bf16 %v1322_v42, %v1319_v40  ;;  %v1821_v44 = vpop.f32.mrb[23].mxu0 }
 0x53b   : > { %1946 = vrot.lane.b32.xlu1 %v1945_v43, %s2294_s14 }
 0x59d   : > { %v1937_v45 = vpop.permute.xlu1 %1936 }
 0x59e   : > { %v1939_v47 = vunpack.i.h.bf16 %v1937_v45  ;;  %v1938_v48 = vunpack.i.l.bf16 %v1937_v45 }
 0x5a0   : > { %v1351_v53 = vsel %vm804_vm2, %v926_v26, %v1939_v47  ;;  %v1350_v0 = vsel %vm804_vm2, %v923_v24, %v1938_v48 }
 0x5a5   : > { %v1942_v46 = vpop.permute.xlu0 %1941 }
 0x5a6   : > { %v1944_v49 = vunpack.i.h.bf16 %v1942_v46  ;;  %v1943_v50 = vunpack.i.l.bf16 %v1942_v46 }
 0x5a8   : > { %v1353_v56 = vsel %vm852_vm3, %v1351_v53, %v1944_v49  ;;  %v1352_v57 = vsel %vm852_vm3, %v1350_v0, %v1943_v50 }
 0x5ad   : > { %v1947_v51 = vpop.permute.xlu1 %1946 }
 0x5ae   : > { %v1949_v54 = vunpack.i.h.bf16 %v1947_v51  ;;  %v1948_v55 = vunpack.i.l.bf16 %v1947_v51 }
 0x5b0   : > { %v1356_v58 = vsel %vm1354_vm5, %v1353_v56, %v1949_v54  ;;  %v1355_v52 = vsel %vm1354_vm5, %v1352_v57, %v1948_v55 }
 0x5b1   : > { %v1357_v59 = vpack.c.bf16 %v1356_v58, %v1355_v52 }
 0x5b3   : > { %1358 = vst.msk [vmem:[#allocation5] sm:$0xff] %vm612_vm1, %v1357_v59 }
 0x5ba   : > { %v1359_v60 = vld [vmem:[#allocation5] sm:$0xff] }
 0x5bb   : > { %1827 = vmatmul.mubr.msk.bf16.vlgmr.msra.gmra.mrb[20].mxu1 %vm612_vm1, %v1359_v60 }
 0x5bc   : > { %2180 = shalt.err (!%p2177_p5)
}
 0x5bd   : > { %s2181_s20 = scalar_lea.hbm %s2812_s3, 512  ;;  %s2185_s5 = scalar_lea.hbm %s2985_s30, 1024 }
 0x5be   : > { %p2182_p8 = scmp.ne.s32.totalorder %s2812_s3, %s2181_s20  ;;  %p2186_p11 = scmp.lt.u32.totalorder %s2812_s3, %s2985_s30 }
 0x5bf   : > { %p2187_p13 = scmp.lt.u32.totalorder %s2185_s5, %s2181_s20  ;;  %p2189_p7 = scmp.lt.u32.totalorder %s2181_s20, %s2812_s3 }
 0x5c0   : > { %p2183_p1 = pnand %p2182_p8, %p2986_p12 }
 0x5c1   : > { %p2188_p3 = por %p2187_p13, %p2186_p11 }
 0x5c2   : > { %p2184_p0 = pneg %p2183_p1 }
 0x5c3   : > { %p2190_p2 = por %p2189_p7, %p2188_p3 }
 0x5c5   : > { %p2191_p6 = pnand %p2190_p2, %p2184_p0 }
 0x5c7   : > { %2194 = shalt.err (!%p2191_p6)
}
 0x5c8   : > { %s2296_s16 = smov 64   ;;  %s2297_s14 = smov 4  }
 0x5c9   : > { %1849 = dma.vmem_to_hbm [thread:$0]  (%p2986_p12), %s2815_s1, 512, %s2812_s3, %s1430_s15, %s2296_s16, %s2296_s16, %s2297_s14  }
 0x5ca   : > { %s1658_s27 = sshll.u32 %s2639_s21, 4  ;;  %s2987_s4 = sld [smem:[#allocation38_spill]] }
 0x5cb   : > { %s554_s18 = scalar_lea.vmem [#allocation17], %s1658_s27  ;;  %s1720_s6 = sshll.u32 %s2386_s25, 8 }
 0x5cc   : > { %s1443_s28 = sshll.u32 %s554_s18, 4  ;;  %s2988_s15 = sld [smem:[#allocation39_spill]]  ;;  %s2846_s28 = int_to_ptr.vmem [resolvable:$true] %s1443_s28 }
 0x5cd   : > { %s1425_s25 = scalar_lea.sflag [#allocation8], %s2639_s21  ;;  %s2195_s24 = scalar_lea.vmem %s2846_s28, 256 }
 0x5ce   : > { %p2196_p9 = scmp.ne.s32.totalorder %s2846_s28, %s2195_s24  ;;  %s2298_s29 = smov [#allocation17]  }
 0x5cf   : > { %s2199_s5 = sshll.u32 %s2298_s29, 4  ;;  %s2200_s5 = int_to_ptr.vmem [resolvable:$false] %s2199_s5 }
 0x5d0   : > { %v1697_v61 = vld [vmem:[%s2987_s4] ss:$0 sm:$0xff]  ;;  %p2197_p10 = pnand %p2196_p9, %p2986_p12  ;;  %s2201_s17 = scalar_lea.vmem %s2200_s5, 512 }
 0x5d1   : > { %p2202_p5 = scmp.lt.s32.totalorder %s2846_s28, %s2200_s5  ;;  %p2203_p8 = scmp.lt.s32.totalorder %s2201_s17, %s2195_s24 }
 0x5d2   : > { %s2852_s20 = scalar_lea.hbm %s2988_s15, %s1720_s6  ;;  %p2198_p4 = pneg %p2197_p10 }
 0x5d3   : > { %p2204_p1 = por %p2203_p8, %p2202_p5 }
 0x5d5   : > { %p2205_p0 = pnand %p2204_p1, %p2198_p4 }
 0x68e   : > { %v1415_v62 = vpop.f32.mrb[20].mxu1 }
 0x68f   : > { %v1416_v63 = vadd.f32 %v1697_v61, %v1415_v62  ;;  %v1828_v1 = vpop.f32.mrb[21].mxu1 }
 0x690   : > { %v1418_v2 = vpop.f32.mrb[22].mxu1 }
 0x691   : > { %1422 = vst.msk [vmem:[%s554_s18] sm:$0xff] %vm612_vm1, %v1416_v63  ;;  %v1419_v3 = vadd.f32 %v1697_v61, %v1418_v2  ;;  %v1829_v4 = vpop.f32.mrb[23].mxu1 }
 0x693   : > { %1423 = vst.msk [vmem:[%s554_s18 + $0x8] sm:$0xff] %vm612_vm1, %v1419_v3 }
 0x694   : > { %2208 = shalt.err (!%p2205_p0)
}
 0x695   : > { %s2209_s11 = scalar_lea.hbm %s2852_s20, 256  ;;  %s2213_s27 = scalar_lea.hbm %s2988_s15, 512 }
 0x696   : > { %p2210_p11 = scmp.ne.s32.totalorder %s2852_s20, %s2209_s11  ;;  %p2214_p7 = scmp.lt.u32.totalorder %s2852_s20, %s2988_s15 }
 0x697   : > { %p2215_p2 = scmp.lt.u32.totalorder %s2213_s27, %s2209_s11  ;;  %p2217_p9 = scmp.lt.u32.totalorder %s2209_s11, %s2852_s20 }
 0x698   : > { %p2211_p13 = pnand %p2210_p11, %p2986_p12 }
 0x699   : > { %p2216_p6 = por %p2215_p2, %p2214_p7 }
 0x69a   : > { %p2212_p3 = pneg %p2211_p13 }
 0x69b   : > { %p2218_p10 = por %p2217_p9, %p2216_p6 }
 0x69d   : > { %p2219_p4 = pnand %p2218_p10, %p2212_p3 }
 0x69f   : > { %2222 = shalt.err (!%p2219_p4)
}
 0x6a0   : > { %s2299_s4 = smov 128  }
 0x6a1   : > { %1848 = dma.vmem_to_hbm [thread:$0]  (%p2986_p12), %s2846_s28, 256, %s2852_s20, %s1425_s25, %s2299_s4, %s2299_s4, %s2292_s26  }
 0x6a2 PF: > { %s2989_s18 = sld [smem:[#allocation26_spill]]  ;;  %s2990_s6 = sld [smem:[#allocation31_spill]] }
 0x6a3   : > { %s2991_s3 = sld [smem:[#allocation27_spill]] }
 0x6a8   : > { %s1474_s1 = sand.u32 1, %s2989_s18   ;;  %p2992_p5 = scmp.ne.s32.totalorder %s2990_s6, 0 }
 0x6a9   : > { %p2993_p8 = scmp.ge.s32.totalorder %s2991_s3, 2  ;;  %s1475_s24 = scalar_lea.sflag [#allocation8], %s1474_s1 }
 0x6ab   : > { %p1873_p1 = pnand %p2993_p8, %p2992_p5 }
 0x6ad   : > { %2256 = dma.done.wait (!%p1873_p1), %s1475_s24, 256  }
 0x6ae   : > { %2258 = vsyncadd (!%p1873_p1), %s1475_s24, 4294967040  ;;  %s1484_s29 = scalar_lea.sflag [#allocation19], %s1474_s1 }
 0x6af   : > { %2260 = dma.done.wait (!%p1873_p1), %s1484_s29, 512  }
 0x6b0   : > { %2262 = vsyncadd (!%p1873_p1), %s1484_s29, 4294966784  ;;  %s2994_s24 = sld [smem:[#allocation28_spill]]  ;;  %s2995_s10 = sld [smem:[#allocation29_spill]] }
 0x6b1   : > { %s2996_s21 = smov %s2269_s22  ;;  %s2997_s22 = smov %s2273_s23 }
 0x6b6   : > { %p34_p12 = scmp.ge.s32.totalorder %s2994_s24, 4   ;;  %s2998_s23 = smov %s2995_s10 }
 0x6b8   :  { %36 = sbr.rel (!%p34_p12) target bundleno = 21 (0x15), region = 165 }
 0x6bf   :  { %1489 = vsyncpa [#allocation7], 1 }
 0x6c0   :  { %1491 = vsyncpa [#allocation7 + $0x1], 1 }
 0x6c1   :  { %1492 = vsyncpa [#allocation10], 1 }
 0x6c2   :  { %1494 = vsyncpa [#allocation10 + $0x1], 1 }
 0x6c3   :  { %1495 = vsyncpa [#allocation13], 1 }
 0x6c4   :  { %1496 = vsyncpa [#allocation16], 1 }
 0x6c5   :  { %1497 = vsyncpa [#allocation8], 1 }
 0x6c6   :  { %1499 = vsyncpa [#allocation8 + $0x1], 1 }
 0x6c7   :  { %1500 = vsyncpa [#allocation19], 1 }
 0x6c8   :  { %1502 = vsyncpa [#allocation19 + $0x1], 1 }

</bundles_post_ra>
